<compile_context>
chip_gen: v7x
topology: tpu7x:2x2x1
jax: 0.10.0
libtpu: 0.0.40
codegen_flags: <defaults>
</compile_context>

<pallas_src>
import jax
import jax.numpy as jnp
from jax.experimental import pallas as pl
from jax.experimental.pallas import tpu as pltpu

IN_DIM = 5 * 16 * 16 + 10     # 1290 (PyTorch Linear input width)
H1 = 512
H2 = 256
OUT_DIM = 6
OUT_PAD = 128                 # lane-dense fc3 output width
NEG_BIG = jnp.float32(-1e30)  # padded-lane logit bias -> exp() underflows to 0


def _round_up(n, m):
    return ((n + m - 1) // m) * m


def policy_net_kernel(x_ref, w1_ref, b1_ref, w2_ref, b2_ref, w3_ref, b3_ref, out_ref):
    # fc1: cast x to bf16 at the MXU input, f32 accumulation; bias + ReLU in f32.
    xb = x_ref[...].astype(jnp.bfloat16)
    h1 = jnp.dot(xb, w1_ref[...], preferred_element_type=jnp.float32)
    h1 = jnp.maximum(h1 + b1_ref[...], 0.0).astype(jnp.bfloat16)
    # fc2
    h2 = jnp.dot(h1, w2_ref[...], preferred_element_type=jnp.float32)
    h2 = jnp.maximum(h2 + b2_ref[...], 0.0).astype(jnp.bfloat16)
    # fc3 (padded to 128 lanes; padded lanes carry -1e30 bias -> softmax weight 0)
    logits = jnp.dot(h2, w3_ref[...], preferred_element_type=jnp.float32) + b3_ref[...]
    # numerically stable softmax over dim=1; exact division so rows sum to 1
    m = jnp.max(logits, axis=1, keepdims=True)
    e = jnp.exp(logits - m)
    denom = jnp.sum(e, axis=1, keepdims=True)
    out_ref[...] = (e / denom).astype(out_ref.dtype)


def _choose_tb(B, tb_max=512):
    """Batch tile: multiple of 8 sublanes, capped at tb_max; prefer >=2 grid steps
    so the 'parallel' grid axis shards across both TensorCores on v7x."""
    b8 = _round_up(max(B, 1), 8)
    tb = min(tb_max, b8)
    if b8 > 8 and _round_up(B, tb) // tb < 2:
        tb = max(8, _round_up((b8 + 1) // 2, 8))
    return tb


def policy_net_forward(x, params, tb_max=512):
    """x: (B, IN_DIM) f32. params: bf16 weights, f32 biases (fc3 padded to OUT_PAD).
    Returns (B, OUT_DIM) f32 softmax probabilities."""
    w1, b1, w2, b2, w3, b3 = params
    B = x.shape[0]
    tb = _choose_tb(B, tb_max)
    b_pad = _round_up(B, tb)
    grid = (b_pad // tb,)

    # Only pad batch rows when needed (no dtype cast / no column pad -> no extra
    # full HBM pass over x; the kernel reads raw f32 rows and casts on-chip).
    x_p = x if b_pad == B else jnp.pad(x, ((0, b_pad - B), (0, 0)))

    def resident(shape):
        # Constant block index across the batch grid -> weights/biases stay in
        # VMEM for the whole call (fetched once, never re-DMA'd).
        return pl.BlockSpec(shape, lambda i: (0, 0))

    flops = 2 * b_pad * (IN_DIM * H1 + H1 * H2 + H2 * OUT_PAD)
    bytes_accessed = (
        x_p.size * x_p.dtype.itemsize
        + sum(int(p.size) * p.dtype.itemsize for p in (w1, b1, w2, b2, w3, b3))
        + b_pad * OUT_PAD * 4)

    out = pl.pallas_call(
        policy_net_kernel,
        out_shape=jax.ShapeDtypeStruct((b_pad, OUT_PAD), jnp.float32),
        grid=grid,
        in_specs=[
            pl.BlockSpec((tb, IN_DIM), lambda i: (i, 0)),   # x: tiled over batch (f32)
            resident((IN_DIM, H1)),                         # W1 (bf16)
            resident((1, H1)),                              # b1 (f32)
            resident((H1, H2)),                             # W2 (bf16)
            resident((1, H2)),                              # b2 (f32)
            resident((H2, OUT_PAD)),                        # W3 (bf16, lane-padded)
            resident((1, OUT_PAD)),                         # b3 (f32, -1e30 pad lanes)
        ],
        out_specs=pl.BlockSpec((tb, OUT_PAD), lambda i: (i, 0)),  # lane-dense store
        compiler_params=pltpu.CompilerParams(
            dimension_semantics=("parallel",)),             # v7x: 2-TC batch sharding
        cost_estimate=pl.CostEstimate(
            flops=flops,
            transcendentals=b_pad * OUT_PAD,
            bytes_accessed=bytes_accessed),
    )(x_p, w1, b1, w2, b2, w3, b3)
    return out[:B, :OUT_DIM]


def init_params(key):
    """Deterministic init mimicking torch.nn.Linear (uniform +/- 1/sqrt(fan_in)).
    Weights stored transposed vs. PyTorch, i.e. (in_features, out_features), cast to
    bf16.  fc3 is lane-padded to OUT_PAD columns: W3 pad columns are 0, b3 pad lanes
    are -1e30 so those lanes contribute exp()=0 to the softmax denominator."""
    ks = jax.random.split(key, 6)

    def linear(kw, kb, fan_in, fan_out):
        bound = 1.0 / jnp.sqrt(jnp.float32(fan_in))
        w = jax.random.uniform(kw, (fan_in, fan_out), jnp.float32, -bound, bound)
        b = jax.random.uniform(kb, (1, fan_out), jnp.float32, -bound, bound)
        return w, b

    w1, b1 = linear(ks[0], ks[1], IN_DIM, H1)
    w2, b2 = linear(ks[2], ks[3], H1, H2)
    w3, b3 = linear(ks[4], ks[5], H2, OUT_DIM)
    # Lane-pad fc3 to OUT_PAD columns.
    w3 = jnp.pad(w3, ((0, 0), (0, OUT_PAD - OUT_DIM)))
    b3 = jnp.pad(b3, ((0, 0), (0, OUT_PAD - OUT_DIM)), constant_values=NEG_BIG)
    return (w1.astype(jnp.bfloat16), b1,
            w2.astype(jnp.bfloat16), b2,
            w3.astype(jnp.bfloat16), b3)


def reference_forward(x, params):
    """Pure-JAX reference mirroring the kernel's precision (bf16 MXU operands,
    f32 accumulation, bf16 intermediates)."""
    w1, b1, w2, b2, w3, b3 = params
    xb = x.astype(jnp.bfloat16)
    h1 = jnp.maximum(jnp.dot(xb, w1, preferred_element_type=jnp.float32) + b1, 0.0)
    h1 = h1.astype(jnp.bfloat16)
    h2 = jnp.maximum(jnp.dot(h1, w2, preferred_element_type=jnp.float32) + b2, 0.0)
    h2 = h2.astype(jnp.bfloat16)
    logits = (jnp.dot(h2, w3[:, :OUT_DIM], preferred_element_type=jnp.float32)
              + b3[:, :OUT_DIM])
    return jax.nn.softmax(logits, axis=1)


def reference_forward_f32(x, params):
    """Full-f32 reference (original PyTorch-equivalent math)."""
    w1, b1, w2, b2, w3, b3 = params
    w1 = w1.astype(jnp.float32)
    w2 = w2.astype(jnp.float32)
    w3 = w3[:, :OUT_DIM].astype(jnp.float32)
    h1 = jnp.maximum(x @ w1 + b1, 0.0)
    h2 = jnp.maximum(h1 @ w2 + b2, 0.0)
    return jax.nn.softmax(h2 @ w3 + b3[:, :OUT_DIM], axis=1)


if __name__ == "__main__":
    key = jax.random.PRNGKey(0)
    kx, kp = jax.random.split(key)
    B = 2
    x = jax.random.normal(kx, (B, IN_DIM), dtype=jnp.float32)
    params = init_params(kp)

    out = policy_net_forward(x, params)
    jax.block_until_ready(out)

    ref = reference_forward(x, params)        # same precision as kernel
    ref32 = reference_forward_f32(x, params)  # sanity check vs f32 math

    assert out.shape == (B, OUT_DIM)
    assert jnp.allclose(out, ref, atol=2e-3, rtol=2e-3)
    assert jnp.allclose(out, ref32, atol=2e-2, rtol=2e-2)
    # exact softmax division -> rows sum to 1 to f32 precision
    assert jnp.allclose(jnp.sum(out, axis=1), jnp.ones((B,)), atol=1e-5)

    print("KERNEL_OK")
</pallas_src>

<mosaic_0001>
module attributes {stable_mosaic.version = 11 : i64} {
  func.func @policy_net_kernel(%arg0: i32, %arg1: memref<8x1290xf32, #tpu.memory_space<vmem>>, %arg2: memref<1290x512xbf16, #tpu.memory_space<vmem>>, %arg3: memref<1x512xf32, #tpu.memory_space<vmem>>, %arg4: memref<512x256xbf16, #tpu.memory_space<vmem>>, %arg5: memref<1x256xf32, #tpu.memory_space<vmem>>, %arg6: memref<256x128xbf16, #tpu.memory_space<vmem>>, %arg7: memref<1x128xf32, #tpu.memory_space<vmem>>, %arg8: memref<8x128xf32, #tpu.memory_space<vmem>>) attributes {dimension_semantics = [#tpu.dimension_semantics<parallel>], iteration_bounds = array<i64: 1>, scalar_prefetch = 0 : i64, scratch_operands = 0 : i64, tpu.core_type = #tpu.core_type<tc>, window_params = [{transform_indices = @transform_0, window_bounds = array<i64: 8, 1290>}, {pipeline_mode = #tpu.pipeline_mode<synchronous>, transform_indices = @transform_1, window_bounds = array<i64: 1290, 512>}, {pipeline_mode = #tpu.pipeline_mode<synchronous>, transform_indices = @transform_2, window_bounds = array<i64: 1, 512>}, {pipeline_mode = #tpu.pipeline_mode<synchronous>, transform_indices = @transform_3, window_bounds = array<i64: 512, 256>}, {pipeline_mode = #tpu.pipeline_mode<synchronous>, transform_indices = @transform_4, window_bounds = array<i64: 1, 256>}, {pipeline_mode = #tpu.pipeline_mode<synchronous>, transform_indices = @transform_5, window_bounds = array<i64: 256, 128>}, {pipeline_mode = #tpu.pipeline_mode<synchronous>, transform_indices = @transform_6, window_bounds = array<i64: 1, 128>}, {transform_indices = @transform_7, window_bounds = array<i64: 8, 128>}]} {
    %c0 = arith.constant 0 : index
    %c0_0 = arith.constant 0 : index
    %0 = vector.load %arg1[%c0, %c0_0] : memref<8x1290xf32, #tpu.memory_space<vmem>>, vector<8x1290xf32>
    %1 = arith.truncf %0 : vector<8x1290xf32> to vector<8x1290xbf16>
    %c0_1 = arith.constant 0 : index
    %c0_2 = arith.constant 0 : index
    %2 = vector.load %arg2[%c0_1, %c0_2] : memref<1290x512xbf16, #tpu.memory_space<vmem>>, vector<1290x512xbf16>
    %cst = arith.constant dense<0.000000e+00> : vector<8x512xf32>
    %3 = tpu.matmul %1, %2, %cst {dimension_numbers = #tpu.dot_dimension_numbers<[1], [0], [0], [1], [0, 0, 1, 1], [], []>} : vector<8x1290xbf16>, vector<1290x512xbf16>, vector<8x512xf32> -> vector<8x512xf32>
    %c0_3 = arith.constant 0 : index
    %c0_4 = arith.constant 0 : index
    %4 = vector.load %arg3[%c0_3, %c0_4] : memref<1x512xf32, #tpu.memory_space<vmem>>, vector<1x512xf32>
    %5 = vector.broadcast %4 : vector<1x512xf32> to vector<8x512xf32>
    %6 = arith.addf %3, %5 : vector<8x512xf32>
    %cst_5 = arith.constant 0.000000e+00 : f32
    %7 = vector.broadcast %cst_5 : f32 to vector<8x512xf32>
    %8 = arith.maximumf %6, %7 : vector<8x512xf32>
    %9 = arith.truncf %8 : vector<8x512xf32> to vector<8x512xbf16>
    %c0_6 = arith.constant 0 : index
    %c0_7 = arith.constant 0 : index
    %10 = vector.load %arg4[%c0_6, %c0_7] : memref<512x256xbf16, #tpu.memory_space<vmem>>, vector<512x256xbf16>
    %cst_8 = arith.constant dense<0.000000e+00> : vector<8x256xf32>
    %11 = tpu.matmul %9, %10, %cst_8 {dimension_numbers = #tpu.dot_dimension_numbers<[1], [0], [0], [1], [0, 0, 1, 1], [], []>} : vector<8x512xbf16>, vector<512x256xbf16>, vector<8x256xf32> -> vector<8x256xf32>
    %c0_9 = arith.constant 0 : index
    %c0_10 = arith.constant 0 : index
    %12 = vector.load %arg5[%c0_9, %c0_10] : memref<1x256xf32, #tpu.memory_space<vmem>>, vector<1x256xf32>
    %13 = vector.broadcast %12 : vector<1x256xf32> to vector<8x256xf32>
    %14 = arith.addf %11, %13 : vector<8x256xf32>
    %cst_11 = arith.constant 0.000000e+00 : f32
    %15 = vector.broadcast %cst_11 : f32 to vector<8x256xf32>
    %16 = arith.maximumf %14, %15 : vector<8x256xf32>
    %17 = arith.truncf %16 : vector<8x256xf32> to vector<8x256xbf16>
    %c0_12 = arith.constant 0 : index
    %c0_13 = arith.constant 0 : index
    %18 = vector.load %arg6[%c0_12, %c0_13] : memref<256x128xbf16, #tpu.memory_space<vmem>>, vector<256x128xbf16>
    %cst_14 = arith.constant dense<0.000000e+00> : vector<8x128xf32>
    %19 = tpu.matmul %17, %18, %cst_14 {dimension_numbers = #tpu.dot_dimension_numbers<[1], [0], [0], [1], [0, 0, 1, 1], [], []>} : vector<8x256xbf16>, vector<256x128xbf16>, vector<8x128xf32> -> vector<8x128xf32>
    %c0_15 = arith.constant 0 : index
    %c0_16 = arith.constant 0 : index
    %20 = vector.load %arg7[%c0_15, %c0_16] : memref<1x128xf32, #tpu.memory_space<vmem>>, vector<1x128xf32>
    %21 = vector.broadcast %20 : vector<1x128xf32> to vector<8x128xf32>
    %22 = arith.addf %19, %21 : vector<8x128xf32>
    %cst_17 = arith.constant dense<0xFF800000> : vector<8xf32>
    %23 = vector.multi_reduction <maximumf>, %22, %cst_17 [1] : vector<8x128xf32> to vector<8xf32>
    %24 = vector.shape_cast %23 : vector<8xf32> to vector<8x1xf32>
    %25 = vector.broadcast %24 : vector<8x1xf32> to vector<8x128xf32>
    %26 = arith.subf %22, %25 : vector<8x128xf32>
    %27 = math.exp %26 : vector<8x128xf32>
    %cst_18 = arith.constant dense<0.000000e+00> : vector<8xf32>
    %28 = vector.multi_reduction <add>, %27, %cst_18 [1] : vector<8x128xf32> to vector<8xf32>
    %29 = vector.shape_cast %28 : vector<8xf32> to vector<8x1xf32>
    %30 = vector.broadcast %29 : vector<8x1xf32> to vector<8x128xf32>
    %31 = arith.divf %27, %30 : vector<8x128xf32>
    %c0_19 = arith.constant 0 : index
    %c0_20 = arith.constant 0 : index
    %32 = vector.load %arg8[%c0_19, %c0_20] : memref<8x128xf32, #tpu.memory_space<vmem>>, vector<8x128xf32>
    tpu.vector_store %arg8[%c0_19, %c0_20], %31 {strides = array<i32>} : memref<8x128xf32, #tpu.memory_space<vmem>>, vector<8x128xf32>,
    return
  }
  func.func @transform_0(%arg0: i32) -> (i32, i32) {
    %c0_i32 = arith.constant 0 : i32
    %c0_i32_0 = arith.constant 0 : i32
    return %arg0, %c0_i32 : i32, i32
  }
  func.func @transform_1(%arg0: i32) -> (i32, i32) {
    %c0_i32 = arith.constant 0 : i32
    %c0_i32_0 = arith.constant 0 : i32
    %c0_i32_1 = arith.constant 0 : i32
    return %c0_i32, %c0_i32_0 : i32, i32
  }
  func.func @transform_2(%arg0: i32) -> (i32, i32) {
    %c0_i32 = arith.constant 0 : i32
    %c0_i32_0 = arith.constant 0 : i32
    %c0_i32_1 = arith.constant 0 : i32
    return %c0_i32, %c0_i32_0 : i32, i32
  }
  func.func @transform_3(%arg0: i32) -> (i32, i32) {
    %c0_i32 = arith.constant 0 : i32
    %c0_i32_0 = arith.constant 0 : i32
    %c0_i32_1 = arith.constant 0 : i32
    return %c0_i32, %c0_i32_0 : i32, i32
  }
  func.func @transform_4(%arg0: i32) -> (i32, i32) {
    %c0_i32 = arith.constant 0 : i32
    %c0_i32_0 = arith.constant 0 : i32
    %c0_i32_1 = arith.constant 0 : i32
    return %c0_i32, %c0_i32_0 : i32, i32
  }
  func.func @transform_5(%arg0: i32) -> (i32, i32) {
    %c0_i32 = arith.constant 0 : i32
    %c0_i32_0 = arith.constant 0 : i32
    %c0_i32_1 = arith.constant 0 : i32
    return %c0_i32, %c0_i32_0 : i32, i32
  }
  func.func @transform_6(%arg0: i32) -> (i32, i32) {
    %c0_i32 = arith.constant 0 : i32
    %c0_i32_0 = arith.constant 0 : i32
    %c0_i32_1 = arith.constant 0 : i32
    return %c0_i32, %c0_i32_0 : i32, i32
  }
  func.func @transform_7(%arg0: i32) -> (i32, i32) {
    %c0_i32 = arith.constant 0 : i32
    %c0_i32_0 = arith.constant 0 : i32
    return %arg0, %c0_i32 : i32, i32
  }
}

</mosaic_0001>

<bundles_post_ra>
// kernel: tpu_custom_call.1
= control target key start
LH: loop header
LB: loop body
LE: loop exit
PB: predicated region body
PF: predicated region fallthrough
CT: control target
= control target key end

     0   :  { %12 = vsyncpa [#allocation3], 0  ;;  %s4810_s0 = inlined_call_operand.hbm [shape: f32[8,1290], index: 0, kind: input, shape index: {}]   ;;  %s4811_s1 = inlined_call_operand.hbm [shape: bf16[1290,512], index: 1, kind: input, shape index: {}]   ;;  %s4812_s2 = inlined_call_operand.hbm [shape: f32[1,512], index: 2, kind: input, shape index: {}]   ;;  %s4813_s3 = inlined_call_operand.hbm [shape: bf16[512,256], index: 3, kind: input, shape index: {}]   ;;  %s4814_s4 = inlined_call_operand.hbm [shape: f32[1,256], index: 4, kind: input, shape index: {}]   ;;  %s4815_s5 = inlined_call_operand.hbm [shape: bf16[256,128], index: 5, kind: input, shape index: {}]   ;;  %s4816_s6 = inlined_call_operand.hbm [shape: f32[1,128], index: 6, kind: input, shape index: {}]   ;;  %s4817_s7 = inlined_call_operand.hbm [shape: f32[8,128], index: 7, kind: output, shape index: {}]  }
   0x1   :  { %13 = vsyncpa [#allocation6], 0 }
   0x2   :  { %14 = vsyncpa [#allocation9], 0 }
   0x3   :  { %15 = vsyncpa [#allocation12], 0 }
   0x4   :  { %16 = vsyncpa [#allocation4], 0  ;;  %s4581_s24 = smov [#allocation5]   ;;  %s4395_s28 = scalar_lea.hbm %s4811_s1, 41472 }
   0x5   :  { %s32_s25 = sshll.u32 %s4581_s24, 4  ;;  %p4396_p0 = scmp.ne.s32.totalorder %s4811_s1, %s4395_s28  ;;  %s33_s25 = int_to_ptr.vmem [resolvable:$true] %s32_s25 }
   0x6   :  { %p4399_p1 = scmp.lt.u32.totalorder %s4395_s28, %s4811_s1 }
   0x8   :  { %p4401_p2 = pnand %p4399_p1, %p4396_p0 }
   0xa   :  { %4404 = shalt.err (!%p4401_p2)
}
   0xb   :  { %s4405_s10 = scalar_lea.vmem %s33_s25, 41472  ;;  %p4410_p4 = scmp.lt.s32.totalorder %s33_s25, %s33_s25 }
   0xc   :  { %p4406_p3 = scmp.ne.s32.totalorder %s33_s25, %s4405_s10  ;;  %p4411_p5 = scmp.lt.s32.totalorder %s4405_s10, %s4405_s10 }
   0xe   :  { %p4412_p6 = por %p4411_p5, %p4410_p4 }
  0x10   :  { %p4413_p7 = pnand %p4412_p6, %p4406_p3 }
  0x12   :  { %4416 = shalt.err (!%p4413_p7)
}
  0x13   :  { %s4582_s11 = smov 256   ;;  %s4583_s12 = smov 16  }
  0x14   :  { %38 = dma.hbm_to_vmem [thread:$0]  %s4811_s1, 41472, %s33_s25, [#allocation6], %s4582_s11, %s4582_s11, %s4583_s12  }
  0x15   :  { %s4584_s15 = smov [#allocation8]   ;;  %s4417_s19 = scalar_lea.hbm %s4813_s3, 8192 }
  0x16   :  { %s54_s16 = sshll.u32 %s4584_s15, 4  ;;  %p4418_p8 = scmp.ne.s32.totalorder %s4813_s3, %s4417_s19  ;;  %s55_s16 = int_to_ptr.vmem [resolvable:$true] %s54_s16 }
  0x17   :  { %p4421_p9 = scmp.lt.u32.totalorder %s4417_s19, %s4813_s3 }
  0x19   :  { %p4423_p10 = pnand %p4421_p9, %p4418_p8 }
  0x1b   :  { %4426 = shalt.err (!%p4423_p10)
}
  0x1c   :  { %s4427_s24 = scalar_lea.vmem %s55_s16, 8192  ;;  %p4432_p12 = scmp.lt.s32.totalorder %s55_s16, %s55_s16 }
  0x1d   :  { %p4428_p11 = scmp.ne.s32.totalorder %s55_s16, %s4427_s24  ;;  %p4433_p13 = scmp.lt.s32.totalorder %s4427_s24, %s4427_s24 }
  0x1f   :  { %p4434_p0 = por %p4433_p13, %p4432_p12 }
  0x21   :  { %p4435_p1 = pnand %p4434_p0, %p4428_p11 }
  0x23   :  { %4438 = shalt.err (!%p4435_p1)
}
  0x24   :  { %s4585_s1 = smov 128   ;;  %s4586_s25 = smov 8  }
  0x25   :  { %60 = dma.hbm_to_vmem [thread:$0]  %s4813_s3, 8192, %s55_s16, [#allocation9], %s4585_s1, %s4585_s1, %s4586_s25  }
  0x26   :  { %s4587_s28 = smov [#allocation11]   ;;  %s4439_s9 = scalar_lea.hbm %s4815_s5, 2048 }
  0x27   :  { %s76_s29 = sshll.u32 %s4587_s28, 4  ;;  %p4440_p2 = scmp.ne.s32.totalorder %s4815_s5, %s4439_s9  ;;  %s77_s29 = int_to_ptr.vmem [resolvable:$true] %s76_s29 }
  0x28   :  { %p4443_p3 = scmp.lt.u32.totalorder %s4439_s9, %s4815_s5 }
  0x2a   :  { %p4445_p4 = pnand %p4443_p3, %p4440_p2 }
  0x2c   :  { %4448 = shalt.err (!%p4445_p4)
}
  0x2d   :  { %s4449_s14 = scalar_lea.vmem %s77_s29, 2048  ;;  %p4454_p6 = scmp.lt.s32.totalorder %s77_s29, %s77_s29 }
  0x2e   :  { %p4450_p5 = scmp.ne.s32.totalorder %s77_s29, %s4449_s14  ;;  %p4455_p7 = scmp.lt.s32.totalorder %s4449_s14, %s4449_s14 }
  0x30   :  { %p4456_p8 = por %p4455_p7, %p4454_p6 }
  0x32   :  { %p4457_p9 = pnand %p4456_p8, %p4450_p5 }
  0x34   :  { %4460 = shalt.err (!%p4457_p9)
}
  0x35   :  { %s4588_s3 = smov 64   ;;  %s4589_s15 = smov 4  }
  0x36   :  { %82 = dma.hbm_to_vmem [thread:$0]  %s4815_s5, 2048, %s77_s29, [#allocation12], %s4588_s3, %s4588_s3, %s4589_s15  }
  0x37   :  { %s4590_s18 = smov [#allocation2]   ;;  %s4591_s20 = smov [#allocation7]  }
  0x38   :  { %s23_s19 = sshll.u32 %s4590_s18, 4  ;;  %s45_s21 = sshll.u32 %s4591_s20, 4  ;;  %s24_s19 = int_to_ptr.vmem [resolvable:$true] %s23_s19  ;;  %s46_s21 = int_to_ptr.vmem [resolvable:$true] %s45_s21 }
  0x39   :  { %s4461_s24 = scalar_lea.hbm %s4810_s0, 1408 }
  0x3a   :  { %p4462_p10 = scmp.ne.s32.totalorder %s4810_s0, %s4461_s24  ;;  %p4465_p11 = scmp.lt.u32.totalorder %s4461_s24, %s4810_s0 }
  0x3c   :  { %p4467_p12 = pnand %p4465_p11, %p4462_p10 }
  0x3e   :  { %4470 = shalt.err (!%p4467_p12)
}
  0x3f   :  { %s4471_s5 = scalar_lea.vmem %s24_s19, 1408  ;;  %p4476_p0 = scmp.lt.s32.totalorder %s24_s19, %s24_s19 }
  0x40   :  { %p4472_p13 = scmp.ne.s32.totalorder %s24_s19, %s4471_s5  ;;  %p4477_p1 = scmp.lt.s32.totalorder %s4471_s5, %s4471_s5 }
  0x42   :  { %p4478_p2 = por %p4477_p1, %p4476_p0 }
  0x44   :  { %p4479_p3 = pnand %p4478_p2, %p4472_p13 }
  0x46   :  { %4482 = shalt.err (!%p4479_p3)
}
  0x47   :  { %26 = dma.hbm_to_vmem [thread:$0]  %s4810_s0, 1408, %s24_s19, [#allocation3]  }
  0x48   :  { %s4483_s9 = scalar_lea.hbm %s4812_s2, 64 }
  0x49   :  { %p4484_p4 = scmp.ne.s32.totalorder %s4812_s2, %s4483_s9  ;;  %p4487_p5 = scmp.lt.u32.totalorder %s4483_s9, %s4812_s2 }
  0x4b   :  { %p4489_p6 = pnand %p4487_p5, %p4484_p4 }
  0x4d   :  { %4492 = shalt.err (!%p4489_p6)
}
  0x4e   :  { %s4493_s14 = scalar_lea.vmem %s46_s21, 64  ;;  %p4498_p8 = scmp.lt.s32.totalorder %s46_s21, %s46_s21 }
  0x4f   :  { %p4494_p7 = scmp.ne.s32.totalorder %s46_s21, %s4493_s14  ;;  %p4499_p9 = scmp.lt.s32.totalorder %s4493_s14, %s4493_s14 }
  0x51   :  { %p4500_p10 = por %p4499_p9, %p4498_p8 }
  0x53   :  { %p4501_p11 = pnand %p4500_p10, %p4494_p7 }
  0x55   :  { %4504 = shalt.err (!%p4501_p11)
}
  0x56   :  { %48 = dma.hbm_to_vmem [thread:$0]  %s4812_s2, 64, %s46_s21, [#allocation6]  }
  0x57   :  { %s4592_s15 = smov [#allocation10]   ;;  %s4593_s17 = smov [#allocation13]  }
  0x58   :  { %s67_s16 = sshll.u32 %s4592_s15, 4  ;;  %s89_s18 = sshll.u32 %s4593_s17, 4  ;;  %s68_s16 = int_to_ptr.vmem [resolvable:$true] %s67_s16  ;;  %s90_s18 = int_to_ptr.vmem [resolvable:$true] %s89_s18 }
  0x59   :  { %s4505_s22 = scalar_lea.hbm %s4814_s4, 32 }
  0x5a   :  { %p4506_p12 = scmp.ne.s32.totalorder %s4814_s4, %s4505_s22  ;;  %p4509_p13 = scmp.lt.u32.totalorder %s4505_s22, %s4814_s4 }
  0x5c   :  { %p4511_p0 = pnand %p4509_p13, %p4506_p12 }
  0x5e   :  { %4514 = shalt.err (!%p4511_p0)
}
  0x5f   :  { %s4515_s2 = scalar_lea.vmem %s68_s16, 32  ;;  %p4520_p2 = scmp.lt.s32.totalorder %s68_s16, %s68_s16 }
  0x60   :  { %p4516_p1 = scmp.ne.s32.totalorder %s68_s16, %s4515_s2  ;;  %p4521_p3 = scmp.lt.s32.totalorder %s4515_s2, %s4515_s2 }
  0x62   :  { %p4522_p4 = por %p4521_p3, %p4520_p2 }
  0x64   :  { %p4523_p5 = pnand %p4522_p4, %p4516_p1 }
  0x66   :  { %4526 = shalt.err (!%p4523_p5)
}
  0x67   :  { %70 = dma.hbm_to_vmem [thread:$0]  %s4814_s4, 32, %s68_s16, [#allocation9]  }
  0x68   :  { %s4527_s28 = scalar_lea.hbm %s4816_s6, 16 }
  0x69   :  { %p4528_p6 = scmp.ne.s32.totalorder %s4816_s6, %s4527_s28  ;;  %p4531_p7 = scmp.lt.u32.totalorder %s4527_s28, %s4816_s6 }
  0x6b   :  { %p4533_p8 = pnand %p4531_p7, %p4528_p6 }
  0x6d   :  { %4536 = shalt.err (!%p4533_p8)
}
  0x6e   :  { %s4537_s10 = scalar_lea.vmem %s90_s18, 16  ;;  %s4541_s11 = scalar_lea.vmem %s90_s18, 32 }
  0x6f   :  { %p4538_p9 = scmp.ne.s32.totalorder %s90_s18, %s4537_s10  ;;  %p4542_p10 = scmp.lt.s32.totalorder %s90_s18, %s90_s18 }
  0x70   :  { %p4543_p11 = scmp.lt.s32.totalorder %s4541_s11, %s4537_s10 }
  0x72   :  { %p4544_p12 = por %p4543_p11, %p4542_p10 }
  0x74   :  { %p4545_p13 = pnand %p4544_p12, %p4538_p9 }
  0x76   :  { %4548 = shalt.err (!%p4545_p13)
}
  0x77   :  { %92 = dma.hbm_to_vmem [thread:$0]  %s4816_s6, 16, %s90_s18, [#allocation12]  }
  0x78   :  { %4571 = dma.done.wait [#allocation3], 1408  }
  0x79   :  { %4572 = vsyncadd [#allocation3], 4294965888 }
  0x7a   :  { %4573 = dma.done.wait [#allocation6], 41536  }
  0x7b   :  { %4574 = vsyncadd [#allocation6], 4294925760 }
  0x7c   :  { %4575 = dma.done.wait [#allocation9], 8224  }
  0x7d   :  { %4576 = vsyncadd [#allocation9], 4294959072 }
  0x7e   :  { %4577 = dma.done.wait [#allocation12], 2064  }
  0x7f   :  { %4578 = vsyncadd [#allocation12], 4294965232  ;;  %v3793_v0 = vld [vmem:[#allocation5 + $0x4] ss:$16 sps:$4 sm:$0xff]   ;;  %v3797_v2 = vld [vmem:[#allocation5] ss:$16 sps:$4 sm:$0xff]  }
  0x80   :  { %v3795_v1 = vld [vmem:[#allocation5 + $0x204] ss:$16 sps:$4 sm:$0xff]   ;;  %2116 = vmatprep.subr.bf16.mxu1 %v3793_v0  ;;  %v3798_v3 = vld [vmem:[#allocation5 + $0x200] ss:$16 sps:$4 sm:$0xff]   ;;  %vm2103_vm0 = vcmask 1044480   ;;  %vm2099_vm1 = vcmask 80896  }
  0x81   :  { %2157 = vmatprep.subr.bf16.mxu0 %v3795_v1  ;;  %v3799_v4 = vld [vmem:[#allocation5 + $0x24] ss:$16 sps:$4 sm:$0xff]   ;;  %2117 = vmatpush1.bf16.msra.mxu1 %v3797_v2  ;;  %v3803_v6 = vld [vmem:[#allocation5 + $0x20] ss:$16 sps:$4 sm:$0xff]   ;;  %s4595_s6 = smov [#allocation14]  }
  0x82   :  { %2158 = vmatpush1.bf16.msra.mxu0 %v3798_v3  ;;  %v3801_v5 = vld [vmem:[#allocation5 + $0x224] ss:$16 sps:$4 sm:$0xff]   ;;  %2118 = vmatprep.subr.bf16.mxu1 %v3799_v4  ;;  %v3804_v7 = vld [vmem:[#allocation5 + $0x220] ss:$16 sps:$4 sm:$0xff]   ;;  %v115_v4 = vld [vmem:[#allocation2] sm:$0xff]  ;;  %s3289_s13 = sshll.u32 %s4595_s6, 4  ;;  %s3290_s13 = int_to_ptr.vmem [resolvable:$true] %s3289_s13 }
  0x83   :  { %2159 = vmatprep.subr.bf16.mxu0 %v3801_v5  ;;  %v3805_v8 = vld [vmem:[#allocation5 + $0x44] ss:$16 sps:$4 sm:$0xff]   ;;  %v3809_v10 = vld [vmem:[#allocation5 + $0x40] ss:$16 sps:$4 sm:$0xff]   ;;  %s4549_s14 = scalar_lea.vmem %s3290_s13, 128  ;;  %p4554_p1 = scmp.lt.s32.totalorder %s3290_s13, %s3290_s13 }
  0x84   :  { %v3807_v9 = vld [vmem:[#allocation5 + $0x244] ss:$16 sps:$4 sm:$0xff]   ;;  %v3810_v11 = vld [vmem:[#allocation5 + $0x240] ss:$16 sps:$4 sm:$0xff]   ;;  %p4550_p0 = scmp.ne.s32.totalorder %s3290_s13, %s4549_s14  ;;  %p4555_p2 = scmp.lt.s32.totalorder %s4549_s14, %s4549_s14 }
  0x85   :  { %2119 = vmatpush1.bf16.msra.mxu1 %v3803_v6  ;;  %v3811_v12 = vld [vmem:[#allocation5 + $0x64] ss:$16 sps:$4 sm:$0xff]   ;;  %v3815_v14 = vld [vmem:[#allocation5 + $0x60] ss:$16 sps:$4 sm:$0xff]   ;;  %v117_v6 = vld [vmem:[#allocation2 + $0x10] sm:$0xff] }
  0x86   :  { %2160 = vmatpush1.bf16.msra.mxu0 %v3804_v7  ;;  %2120 = vmatprep.subr.bf16.mxu1 %v3805_v8  ;;  %v3813_v13 = vld [vmem:[#allocation5 + $0x264] ss:$16 sps:$4 sm:$0xff]   ;;  %v3816_v15 = vld [vmem:[#allocation5 + $0x260] ss:$16 sps:$4 sm:$0xff]   ;;  %v3894_v7 = vld [vmem:[#allocation5 + $0xc] ss:$16 sps:$4 sm:$0xff]   ;;  %v4726_v8 = vpack.c.bf16 %v115_v4, %v115_v4  ;;  %p4556_p3 = por %p4555_p2, %p4554_p1 }
  0x87   :  { %2161 = vmatprep.subr.bf16.mxu0 %v3807_v9  ;;  %v3817_v16 = vld [vmem:[#allocation5 + $0x84] ss:$16 sps:$4 sm:$0xff]   ;;  %v3821_v18 = vld [vmem:[#allocation5 + $0x80] ss:$16 sps:$4 sm:$0xff]   ;;  %v3978_v4 = vld [vmem:[#allocation5 + $0x1cc] ss:$16 sps:$4 sm:$0xff]  }
  0x88   :  { %v3819_v17 = vld [vmem:[#allocation5 + $0x284] ss:$16 sps:$4 sm:$0xff]   ;;  %v3822_v19 = vld [vmem:[#allocation5 + $0x280] ss:$16 sps:$4 sm:$0xff]   ;;  %p4557_p4 = pnand %p4556_p3, %p4550_p0 }
  0x89   :  { %2121 = vmatpush1.bf16.msra.mxu1 %v3809_v10  ;;  %v3823_v20 = vld [vmem:[#allocation5 + $0xa4] ss:$16 sps:$4 sm:$0xff]   ;;  %v3827_v22 = vld [vmem:[#allocation5 + $0xa0] ss:$16 sps:$4 sm:$0xff]   ;;  %v3892_v10 = vld [vmem:[#allocation5 + $0x8] ss:$16 sps:$4 sm:$0xff]  }
  0x8a   :  { %2162 = vmatpush1.bf16.msra.mxu0 %v3810_v11  ;;  %2122 = vmatprep.subr.bf16.mxu1 %v3811_v12  ;;  %v3825_v21 = vld [vmem:[#allocation5 + $0x2a4] ss:$16 sps:$4 sm:$0xff]   ;;  %v3828_v23 = vld [vmem:[#allocation5 + $0x2a0] ss:$16 sps:$4 sm:$0xff]   ;;  %v4728_v11 = vpack.c.bf16 %v117_v6, %v117_v6  ;;  %v3976_v6 = vld [vmem:[#allocation5 + $0x1c8] ss:$16 sps:$4 sm:$0xff]  }
  0x8b   :  { %2163 = vmatprep.subr.bf16.mxu0 %v3813_v13  ;;  %v3829_v24 = vld [vmem:[#allocation5 + $0xc4] ss:$16 sps:$4 sm:$0xff]   ;;  %v3833_v26 = vld [vmem:[#allocation5 + $0xc0] ss:$16 sps:$4 sm:$0xff]   ;;  %v3900_v13 = vld [vmem:[#allocation5 + $0x2c] ss:$16 sps:$4 sm:$0xff]  }
  0x8c   :  { %v3831_v25 = vld [vmem:[#allocation5 + $0x2c4] ss:$16 sps:$4 sm:$0xff]   ;;  %v3834_v27 = vld [vmem:[#allocation5 + $0x2c0] ss:$16 sps:$4 sm:$0xff]  }
  0x8d   :  { %2123 = vmatpush1.bf16.msra.mxu1 %v3815_v14  ;;  %v3835_v28 = vld [vmem:[#allocation5 + $0xe4] ss:$16 sps:$4 sm:$0xff]   ;;  %v3839_v30 = vld [vmem:[#allocation5 + $0xe0] ss:$16 sps:$4 sm:$0xff]  }
  0x8e   :  { %2164 = vmatpush1.bf16.msra.mxu0 %v3816_v15  ;;  %2124 = vmatprep.subr.bf16.mxu1 %v3817_v16  ;;  %v3837_v29 = vld [vmem:[#allocation5 + $0x2e4] ss:$16 sps:$4 sm:$0xff]   ;;  %v3840_v31 = vld [vmem:[#allocation5 + $0x2e0] ss:$16 sps:$4 sm:$0xff]   ;;  %v3898_v15 = vld [vmem:[#allocation5 + $0x28] ss:$16 sps:$4 sm:$0xff]  }
  0x8f   :  { %2165 = vmatprep.subr.bf16.mxu0 %v3819_v17  ;;  %v3841_v32 = vld [vmem:[#allocation5 + $0x104] ss:$16 sps:$4 sm:$0xff]   ;;  %v3845_v34 = vld [vmem:[#allocation5 + $0x100] ss:$16 sps:$4 sm:$0xff]   ;;  %v3906_v17 = vld [vmem:[#allocation5 + $0x4c] ss:$16 sps:$4 sm:$0xff]  }
  0x90   :  { %v3843_v33 = vld [vmem:[#allocation5 + $0x304] ss:$16 sps:$4 sm:$0xff]   ;;  %v3846_v35 = vld [vmem:[#allocation5 + $0x300] ss:$16 sps:$4 sm:$0xff]  }
  0x91   :  { %2125 = vmatpush1.bf16.msra.mxu1 %v3821_v18  ;;  %v3847_v36 = vld [vmem:[#allocation5 + $0x124] ss:$16 sps:$4 sm:$0xff]   ;;  %v3851_v38 = vld [vmem:[#allocation5 + $0x120] ss:$16 sps:$4 sm:$0xff]  }
  0x92   :  { %2166 = vmatpush1.bf16.msra.mxu0 %v3822_v19  ;;  %2126 = vmatprep.subr.bf16.mxu1 %v3823_v20  ;;  %v3849_v37 = vld [vmem:[#allocation5 + $0x324] ss:$16 sps:$4 sm:$0xff]   ;;  %v3852_v39 = vld [vmem:[#allocation5 + $0x320] ss:$16 sps:$4 sm:$0xff]   ;;  %v3904_v19 = vld [vmem:[#allocation5 + $0x48] ss:$16 sps:$4 sm:$0xff]  }
  0x93   :  { %2167 = vmatprep.subr.bf16.mxu0 %v3825_v21  ;;  %v3853_v40 = vld [vmem:[#allocation5 + $0x144] ss:$16 sps:$4 sm:$0xff]   ;;  %v3857_v42 = vld [vmem:[#allocation5 + $0x140] ss:$16 sps:$4 sm:$0xff]   ;;  %v3912_v21 = vld [vmem:[#allocation5 + $0x6c] ss:$16 sps:$4 sm:$0xff]  }
  0x94   :  { %v3855_v41 = vld [vmem:[#allocation5 + $0x344] ss:$16 sps:$4 sm:$0xff]   ;;  %v3858_v43 = vld [vmem:[#allocation5 + $0x340] ss:$16 sps:$4 sm:$0xff]  }
  0x95   :  { %2127 = vmatpush1.bf16.msra.mxu1 %v3827_v22  ;;  %v3859_v44 = vld [vmem:[#allocation5 + $0x164] ss:$16 sps:$4 sm:$0xff]   ;;  %v3863_v47 = vld [vmem:[#allocation5 + $0x160] ss:$16 sps:$4 sm:$0xff]  }
  0x96   :  { %2168 = vmatpush1.bf16.msra.mxu0 %v3828_v23  ;;  %2128 = vmatprep.subr.bf16.mxu1 %v3829_v24  ;;  %v3861_v45 = vld [vmem:[#allocation5 + $0x364] ss:$16 sps:$4 sm:$0xff]   ;;  %v3864_v50 = vld [vmem:[#allocation5 + $0x360] ss:$16 sps:$4 sm:$0xff]   ;;  %v3910_v23 = vld [vmem:[#allocation5 + $0x68] ss:$16 sps:$4 sm:$0xff]  }
  0x97   :  { %2169 = vmatprep.subr.bf16.mxu0 %v3831_v25  ;;  %v116_v46 = vld [vmem:[#allocation2 + $0x8] sm:$0xff]  ;;  %v118_v49 = vld [vmem:[#allocation2 + $0x18] sm:$0xff]  ;;  %v3918_v25 = vld [vmem:[#allocation5 + $0x8c] ss:$16 sps:$4 sm:$0xff]  }
  0x98   :  { %v4720_v48 = vpack.c.bf16 %v116_v46, %v116_v46  ;;  %v3865_v51 = vld [vmem:[#allocation5 + $0x184] ss:$16 sps:$4 sm:$0xff]   ;;  %v4722_v52 = vpack.c.bf16 %v118_v49, %v118_v49  ;;  %v3869_v54 = vld [vmem:[#allocation5 + $0x180] ss:$16 sps:$4 sm:$0xff]   ;;  %v3946_v49 = vld [vmem:[#allocation5 + $0x128] ss:$16 sps:$4 sm:$0xff]  }
  0x99   :  { %2129 = vmatpush1.bf16.msra.mxu1 %v3833_v26  ;;  %v3867_v53 = vld [vmem:[#allocation5 + $0x384] ss:$16 sps:$4 sm:$0xff]   ;;  %v3870_v55 = vld [vmem:[#allocation5 + $0x380] ss:$16 sps:$4 sm:$0xff]  }
  0x9a   :  { %2170 = vmatpush1.bf16.msra.mxu0 %v3834_v27  ;;  %2130 = vmatprep.subr.bf16.mxu1 %v3835_v28  ;;  %v3871_v56 = vld [vmem:[#allocation5 + $0x1a4] ss:$16 sps:$4 sm:$0xff]   ;;  %v3875_v58 = vld [vmem:[#allocation5 + $0x1a0] ss:$16 sps:$4 sm:$0xff]   ;;  %v3916_v27 = vld [vmem:[#allocation5 + $0x88] ss:$16 sps:$4 sm:$0xff]  }
  0x9b   :  { %2171 = vmatprep.subr.bf16.mxu0 %v3837_v29  ;;  %2148 = vmatprep.mubr.bf16.mxu1 %v4720_v48  ;;  %v3873_v57 = vld [vmem:[#allocation5 + $0x3a4] ss:$16 sps:$4 sm:$0xff]   ;;  %v3876_v59 = vld [vmem:[#allocation5 + $0x3a0] ss:$16 sps:$4 sm:$0xff]   ;;  %v3924_v29 = vld [vmem:[#allocation5 + $0xac] ss:$16 sps:$4 sm:$0xff]  }
  0x9c   :  { %2189 = vmatprep.mubr.bf16.mxu0 %v4722_v52  ;;  %v3877_v60 = vld [vmem:[#allocation5 + $0x1c4] ss:$16 sps:$4 sm:$0xff]   ;;  %v3881_v62 = vld [vmem:[#allocation5 + $0x1c0] ss:$16 sps:$4 sm:$0xff]  }
  0x9d   :  { %2131 = vmatpush1.bf16.msra.mxu1 %v3839_v30  ;;  %v3879_v61 = vld [vmem:[#allocation5 + $0x3c4] ss:$16 sps:$4 sm:$0xff]   ;;  %v3882_v63 = vld [vmem:[#allocation5 + $0x3c0] ss:$16 sps:$4 sm:$0xff]  }
  0x9e   :  { %2172 = vmatpush1.bf16.msra.mxu0 %v3840_v31  ;;  %2132 = vmatprep.subr.bf16.mxu1 %v3841_v32  ;;  %v3883_v0 = vld [vmem:[#allocation5 + $0x1e4] ss:$16 sps:$4 sm:$0xff]   ;;  %v3887_v2 = vld [vmem:[#allocation5 + $0x1e0] ss:$16 sps:$4 sm:$0xff]   ;;  %v3922_v31 = vld [vmem:[#allocation5 + $0xa8] ss:$16 sps:$4 sm:$0xff]  }
  0x9f   :  { %2173 = vmatprep.subr.bf16.mxu0 %v3843_v33  ;;  %v3885_v1 = vld [vmem:[#allocation5 + $0x3e4] ss:$16 sps:$4 sm:$0xff]   ;;  %v3888_v3 = vld [vmem:[#allocation5 + $0x3e0] ss:$16 sps:$4 sm:$0xff]   ;;  %v3930_v33 = vld [vmem:[#allocation5 + $0xcc] ss:$16 sps:$4 sm:$0xff]  }
  0xa0   :  { %v3891_v5 = vld [vmem:[#allocation5 + $0x404] ss:$16 sps:$4 sm:$0xff]   ;;  %v3889_v9 = vld [vmem:[#allocation5 + $0x400] ss:$16 sps:$4 sm:$0xff]  }
  0xa1   :  { %2133 = vmatpush1.bf16.msra.mxu1 %v3845_v34  ;;  %v3897_v12 = vld [vmem:[#allocation5 + $0x424] ss:$16 sps:$4 sm:$0xff]   ;;  %v3895_v14 = vld [vmem:[#allocation5 + $0x420] ss:$16 sps:$4 sm:$0xff]  }
  0xa2   :  { %2174 = vmatpush1.bf16.msra.mxu0 %v3846_v35  ;;  %2134 = vmatprep.subr.bf16.mxu1 %v3847_v36  ;;  %v3903_v16 = vld [vmem:[#allocation5 + $0x444] ss:$16 sps:$4 sm:$0xff]   ;;  %v3901_v18 = vld [vmem:[#allocation5 + $0x440] ss:$16 sps:$4 sm:$0xff]  }
  0xa3   :  { %2175 = vmatprep.subr.bf16.mxu0 %v3849_v37  ;;  %v3909_v20 = vld [vmem:[#allocation5 + $0x464] ss:$16 sps:$4 sm:$0xff]   ;;  %v3907_v22 = vld [vmem:[#allocation5 + $0x460] ss:$16 sps:$4 sm:$0xff]   ;;  %v3928_v37 = vld [vmem:[#allocation5 + $0xc8] ss:$16 sps:$4 sm:$0xff]  }
  0xa4   :  { %v3915_v24 = vld [vmem:[#allocation5 + $0x484] ss:$16 sps:$4 sm:$0xff]   ;;  %v3913_v26 = vld [vmem:[#allocation5 + $0x480] ss:$16 sps:$4 sm:$0xff]  }
  0xa5   :  { %2135 = vmatpush1.bf16.msra.mxu1 %v3851_v38  ;;  %v3921_v28 = vld [vmem:[#allocation5 + $0x4a4] ss:$16 sps:$4 sm:$0xff]   ;;  %v3919_v30 = vld [vmem:[#allocation5 + $0x4a0] ss:$16 sps:$4 sm:$0xff]  }
  0xa6   :  { %2176 = vmatpush1.bf16.msra.mxu0 %v3852_v39  ;;  %2136 = vmatprep.subr.bf16.mxu1 %v3853_v40  ;;  %v3927_v32 = vld [vmem:[#allocation5 + $0x4c4] ss:$16 sps:$4 sm:$0xff]   ;;  %v3925_v35 = vld [vmem:[#allocation5 + $0x4c0] ss:$16 sps:$4 sm:$0xff]   ;;  %v3936_v39 = vld [vmem:[#allocation5 + $0xec] ss:$16 sps:$4 sm:$0xff]  }
  0xa7   :  { %2177 = vmatprep.subr.bf16.mxu0 %v3855_v41  ;;  %v120_v34 = vld [vmem:[#allocation2 + $0x28] sm:$0xff]  ;;  %v3934_v41 = vld [vmem:[#allocation5 + $0xe8] ss:$16 sps:$4 sm:$0xff]  }
  0xa8   :  { %v4733_v36 = vpack.c.bf16 %v120_v34, %v120_v34  ;;  %v3933_v38 = vld [vmem:[#allocation5 + $0x4e4] ss:$16 sps:$4 sm:$0xff]   ;;  %v3931_v40 = vld [vmem:[#allocation5 + $0x4e0] ss:$16 sps:$4 sm:$0xff]  }
  0xa9   :  { %2137 = vmatpush1.bf16.msra.mxu1 %v3857_v42  ;;  %v3939_v42 = vld [vmem:[#allocation5 + $0x504] ss:$16 sps:$4 sm:$0xff]   ;;  %v4009_v34 = vld [vmem:[#allocation5 + $0x680] ss:$16 sps:$4 sm:$0xff]  }
  0xaa   :  { %2178 = vmatpush1.bf16.msra.mxu0 %v3858_v43  ;;  %2138 = vmatprep.subr.bf16.mxu1 %v3859_v44  ;;  %v3942_v43 = vld [vmem:[#allocation5 + $0x10c] ss:$16 sps:$4 sm:$0xff]   ;;  %v3937_v44 = vld [vmem:[#allocation5 + $0x500] ss:$16 sps:$4 sm:$0xff]   ;;  %v3945_v46 = vld [vmem:[#allocation5 + $0x524] ss:$16 sps:$4 sm:$0xff]  }
  0xab   :  { %2179 = vmatprep.subr.bf16.mxu0 %v3861_v45  ;;  %v3940_v45 = vld [vmem:[#allocation5 + $0x108] ss:$16 sps:$4 sm:$0xff]  }
  0xad   :  { %2139 = vmatpush1.bf16.msra.mxu1 %v3863_v47  ;;  %v3948_v47 = vld [vmem:[#allocation5 + $0x12c] ss:$16 sps:$4 sm:$0xff]  }
  0xae   :  { %2180 = vmatpush1.bf16.msra.mxu0 %v3864_v50  ;;  %2140 = vmatprep.subr.bf16.mxu1 %v3865_v51  ;;  %v3951_v50 = vld [vmem:[#allocation5 + $0x544] ss:$16 sps:$4 sm:$0xff]   ;;  %v3954_v51 = vld [vmem:[#allocation5 + $0x14c] ss:$16 sps:$4 sm:$0xff]  }
  0xaf   :  { %2181 = vmatprep.subr.bf16.mxu0 %v3867_v53  ;;  %v3949_v53 = vld [vmem:[#allocation5 + $0x540] ss:$16 sps:$4 sm:$0xff]  }
  0xb1   :  { %2141 = vmatpush1.bf16.msra.mxu1 %v3869_v54  ;;  %v3952_v54 = vld [vmem:[#allocation5 + $0x148] ss:$16 sps:$4 sm:$0xff]  }
  0xb2   :  { %2182 = vmatpush1.bf16.msra.mxu0 %v3870_v55  ;;  %2142 = vmatprep.subr.bf16.mxu1 %v3871_v56  ;;  %v3957_v55 = vld [vmem:[#allocation5 + $0x564] ss:$16 sps:$4 sm:$0xff]   ;;  %v3960_v56 = vld [vmem:[#allocation5 + $0x16c] ss:$16 sps:$4 sm:$0xff]  }
  0xb3   :  { %2183 = vmatprep.subr.bf16.mxu0 %v3873_v57  ;;  %v3955_v57 = vld [vmem:[#allocation5 + $0x560] ss:$16 sps:$4 sm:$0xff]  }
  0xb5   :  { %2143 = vmatpush1.bf16.msra.mxu1 %v3875_v58  ;;  %v3958_v58 = vld [vmem:[#allocation5 + $0x168] ss:$16 sps:$4 sm:$0xff]  }
  0xb6   :  { %2184 = vmatpush1.bf16.msra.mxu0 %v3876_v59  ;;  %2144 = vmatprep.subr.bf16.mxu1 %v3877_v60  ;;  %v3963_v59 = vld [vmem:[#allocation5 + $0x584] ss:$16 sps:$4 sm:$0xff]   ;;  %v3966_v60 = vld [vmem:[#allocation5 + $0x18c] ss:$16 sps:$4 sm:$0xff]  }
  0xb7   :  { %2185 = vmatprep.subr.bf16.mxu0 %v3879_v61  ;;  %v3961_v61 = vld [vmem:[#allocation5 + $0x580] ss:$16 sps:$4 sm:$0xff]  }
  0xb9   :  { %2145 = vmatpush1.bf16.msra.mxu1 %v3881_v62  ;;  %v3964_v62 = vld [vmem:[#allocation5 + $0x188] ss:$16 sps:$4 sm:$0xff]  }
  0xba   :  { %2186 = vmatpush1.bf16.msra.mxu0 %v3882_v63  ;;  %2146 = vmatprep.subr.bf16.mxu1 %v3883_v0  ;;  %v3969_v63 = vld [vmem:[#allocation5 + $0x5a4] ss:$16 sps:$4 sm:$0xff]   ;;  %v3972_v0 = vld [vmem:[#allocation5 + $0x1ac] ss:$16 sps:$4 sm:$0xff]  }
  0xbb   :  { %2187 = vmatprep.subr.bf16.mxu0 %v3885_v1  ;;  %v3967_v1 = vld [vmem:[#allocation5 + $0x5a0] ss:$16 sps:$4 sm:$0xff]  }
  0xbd   :  { %2147 = vmatpush1.bf16.msra.mxu1 %v3887_v2  ;;  %v3970_v2 = vld [vmem:[#allocation5 + $0x1a8] ss:$16 sps:$4 sm:$0xff]  }
  0xbe   :  { %2188 = vmatpush1.bf16.msra.mxu0 %v3888_v3  ;;  %2362 = vmatprep.subr.bf16.mxu1 %v3894_v7  ;;  %v3975_v3 = vld [vmem:[#allocation5 + $0x5c4] ss:$16 sps:$4 sm:$0xff]  }
  0xbf   :  { %2198 = vmatprep.subr.bf16.mxu0 %v3891_v5  ;;  %v3973_v5 = vld [vmem:[#allocation5 + $0x5c0] ss:$16 sps:$4 sm:$0xff]   ;;  %v3981_v7 = vld [vmem:[#allocation5 + $0x5e4] ss:$16 sps:$4 sm:$0xff]  }
  0xc0   :  { %2149 = vmatmul.mubr.bf16.vlgmr.msra.gmra.mrb[0].mxu1 %v4726_v8 }
  0xc1   :  { %2190 = vmatmul.mubr.bf16.vlgmr.msra.gmra.mrb[0].mxu0 %v4728_v11  ;;  %2363 = vmatpush1.bf16.msra.mxu1 %v3892_v10  ;;  %v3979_v10 = vld [vmem:[#allocation5 + $0x5e0] ss:$16 sps:$4 sm:$0xff]  }
  0xc2   :  { %2199 = vmatpush1.bf16.msra.mxu0 %v3889_v9  ;;  %2364 = vmatprep.subr.bf16.mxu1 %v3900_v13  ;;  %v3984_v9 = vld [vmem:[#allocation5 + $0x1ec] ss:$16 sps:$4 sm:$0xff]  }
  0xc3   :  { %2200 = vmatprep.subr.bf16.mxu0 %v3897_v12  ;;  %2394 = vmatprep.mubr.bf16.mxu1 %v4720_v48  ;;  %v3943_v48 = vld [vmem:[#allocation5 + $0x520] ss:$16 sps:$4 sm:$0xff]   ;;  %v3982_v12 = vld [vmem:[#allocation5 + $0x1e8] ss:$16 sps:$4 sm:$0xff]  }
  0xc4   :  { %2230 = vmatprep.mubr.bf16.mxu0 %v4733_v36  ;;  %v119_v13 = vld [vmem:[#allocation2 + $0x20] sm:$0xff] }
  0xc5   :  { %2365 = vmatpush1.bf16.msra.mxu1 %v3898_v15  ;;  %v3990_v15 = vld [vmem:[#allocation5 + $0x20c] ss:$16 sps:$4 sm:$0xff]  }
  0xc6   :  { %2201 = vmatpush1.bf16.msra.mxu0 %v3895_v14  ;;  %2366 = vmatprep.subr.bf16.mxu1 %v3906_v17  ;;  %v3987_v14 = vld [vmem:[#allocation5 + $0x604] ss:$16 sps:$4 sm:$0xff]   ;;  %v3985_v17 = vld [vmem:[#allocation5 + $0x600] ss:$16 sps:$4 sm:$0xff]  }
  0xc7   :  { %2202 = vmatprep.subr.bf16.mxu0 %v3903_v16  ;;  %v4736_v16 = vpack.c.bf16 %v119_v13, %v119_v13  ;;  %v4069_v13 = vld [vmem:[#allocation5 + $0x7c0] ss:$16 sps:$4 sm:$0xff]  }
  0xc9   :  { %2367 = vmatpush1.bf16.msra.mxu1 %v3904_v19  ;;  %v3993_v19 = vld [vmem:[#allocation5 + $0x624] ss:$16 sps:$4 sm:$0xff]  }
  0xca   :  { %2203 = vmatpush1.bf16.msra.mxu0 %v3901_v18  ;;  %2368 = vmatprep.subr.bf16.mxu1 %v3912_v21  ;;  %v3988_v18 = vld [vmem:[#allocation5 + $0x208] ss:$16 sps:$4 sm:$0xff]   ;;  %v122_v21 = vld [vmem:[#allocation2 + $0x38] sm:$0xff] }
  0xcb   :  { %2204 = vmatprep.subr.bf16.mxu0 %v3909_v20  ;;  %v3996_v20 = vld [vmem:[#allocation5 + $0x22c] ss:$16 sps:$4 sm:$0xff]  }
  0xcd   :  { %2369 = vmatpush1.bf16.msra.mxu1 %v3910_v23  ;;  %v4740_v23 = vpack.c.bf16 %v122_v21, %v122_v21  ;;  %v121_v21 = vld [vmem:[#allocation2 + $0x30] sm:$0xff] }
  0xce   :  { %2205 = vmatpush1.bf16.msra.mxu0 %v3907_v22  ;;  %2370 = vmatprep.subr.bf16.mxu1 %v3918_v25  ;;  %v3991_v22 = vld [vmem:[#allocation5 + $0x620] ss:$16 sps:$4 sm:$0xff]   ;;  %v3999_v25 = vld [vmem:[#allocation5 + $0x644] ss:$16 sps:$4 sm:$0xff]  }
  0xcf   :  { %2206 = vmatprep.subr.bf16.mxu0 %v3915_v24  ;;  %v3994_v24 = vld [vmem:[#allocation5 + $0x228] ss:$16 sps:$4 sm:$0xff]  }
  0xd1   :  { %2371 = vmatpush1.bf16.msra.mxu1 %v3916_v27  ;;  %v3997_v27 = vld [vmem:[#allocation5 + $0x640] ss:$16 sps:$4 sm:$0xff]  }
  0xd2   :  { %2207 = vmatpush1.bf16.msra.mxu0 %v3913_v26  ;;  %2372 = vmatprep.subr.bf16.mxu1 %v3924_v29  ;;  %v4002_v26 = vld [vmem:[#allocation5 + $0x24c] ss:$16 sps:$4 sm:$0xff]   ;;  %v4005_v29 = vld [vmem:[#allocation5 + $0x664] ss:$16 sps:$4 sm:$0xff]  }
  0xd3   :  { %2208 = vmatprep.subr.bf16.mxu0 %v3921_v28  ;;  %v4000_v28 = vld [vmem:[#allocation5 + $0x248] ss:$16 sps:$4 sm:$0xff]  }
  0xd5   :  { %2373 = vmatpush1.bf16.msra.mxu1 %v3922_v31  ;;  %v4006_v31 = vld [vmem:[#allocation5 + $0x268] ss:$16 sps:$4 sm:$0xff]  }
  0xd6   :  { %2209 = vmatpush1.bf16.msra.mxu0 %v3919_v30  ;;  %2374 = vmatprep.subr.bf16.mxu1 %v3930_v33  ;;  %v4003_v30 = vld [vmem:[#allocation5 + $0x660] ss:$16 sps:$4 sm:$0xff]   ;;  %v4014_v33 = vld [vmem:[#allocation5 + $0x28c] ss:$16 sps:$4 sm:$0xff]  }
  0xd7   :  { %2210 = vmatprep.subr.bf16.mxu0 %v3927_v32  ;;  %v4011_v32 = vld [vmem:[#allocation5 + $0x684] ss:$16 sps:$4 sm:$0xff]  }
  0xd9   :  { %2375 = vmatpush1.bf16.msra.mxu1 %v3928_v37  ;;  %v4020_v37 = vld [vmem:[#allocation5 + $0x2ac] ss:$16 sps:$4 sm:$0xff]  }
  0xda   :  { %2211 = vmatpush1.bf16.msra.mxu0 %v3925_v35  ;;  %2376 = vmatprep.subr.bf16.mxu1 %v3936_v39  ;;  %v4012_v35 = vld [vmem:[#allocation5 + $0x288] ss:$16 sps:$4 sm:$0xff]  }
  0xdb   :  { %2212 = vmatprep.subr.bf16.mxu0 %v3933_v38  ;;  %v4015_v38 = vld [vmem:[#allocation5 + $0x6a0] ss:$16 sps:$4 sm:$0xff]   ;;  %v4018_v39 = vld [vmem:[#allocation5 + $0x2a8] ss:$16 sps:$4 sm:$0xff]  }
  0xdd   :  { %2377 = vmatpush1.bf16.msra.mxu1 %v3934_v41  ;;  %v4026_v41 = vld [vmem:[#allocation5 + $0x2cc] ss:$16 sps:$4 sm:$0xff]  }
  0xde   :  { %2213 = vmatpush1.bf16.msra.mxu0 %v3931_v40  ;;  %2378 = vmatprep.subr.bf16.mxu1 %v3942_v43  ;;  %v4023_v40 = vld [vmem:[#allocation5 + $0x6c4] ss:$16 sps:$4 sm:$0xff]   ;;  %v4024_v43 = vld [vmem:[#allocation5 + $0x2c8] ss:$16 sps:$4 sm:$0xff]  }
  0xdf   :  { %2214 = vmatprep.subr.bf16.mxu0 %v3939_v42  ;;  %v4021_v42 = vld [vmem:[#allocation5 + $0x6c0] ss:$16 sps:$4 sm:$0xff]  }
  0xe1   :  { %2379 = vmatpush1.bf16.msra.mxu1 %v3940_v45  ;;  %v4032_v45 = vld [vmem:[#allocation5 + $0x2ec] ss:$16 sps:$4 sm:$0xff]  }
  0xe2   :  { %2215 = vmatpush1.bf16.msra.mxu0 %v3937_v44  ;;  %2380 = vmatprep.subr.bf16.mxu1 %v3948_v47  ;;  %v4029_v44 = vld [vmem:[#allocation5 + $0x6e4] ss:$16 sps:$4 sm:$0xff]   ;;  %v4030_v47 = vld [vmem:[#allocation5 + $0x2e8] ss:$16 sps:$4 sm:$0xff]  }
  0xe3   :  { %2216 = vmatprep.subr.bf16.mxu0 %v3945_v46  ;;  %v4027_v46 = vld [vmem:[#allocation5 + $0x6e0] ss:$16 sps:$4 sm:$0xff]  }
  0xe5   :  { %2381 = vmatpush1.bf16.msra.mxu1 %v3946_v49  ;;  %v4038_v49 = vld [vmem:[#allocation5 + $0x30c] ss:$16 sps:$4 sm:$0xff]  }
  0xe6   :  { %2217 = vmatpush1.bf16.msra.mxu0 %v3943_v48  ;;  %2382 = vmatprep.subr.bf16.mxu1 %v3954_v51  ;;  %v4035_v48 = vld [vmem:[#allocation5 + $0x704] ss:$16 sps:$4 sm:$0xff]   ;;  %v4036_v51 = vld [vmem:[#allocation5 + $0x308] ss:$16 sps:$4 sm:$0xff]  }
  0xe7   :  { %2218 = vmatprep.subr.bf16.mxu0 %v3951_v50  ;;  %v4033_v50 = vld [vmem:[#allocation5 + $0x700] ss:$16 sps:$4 sm:$0xff]  }
  0xe9   :  { %2383 = vmatpush1.bf16.msra.mxu1 %v3952_v54  ;;  %v4044_v54 = vld [vmem:[#allocation5 + $0x32c] ss:$16 sps:$4 sm:$0xff]  }
  0xea   :  { %2219 = vmatpush1.bf16.msra.mxu0 %v3949_v53  ;;  %2384 = vmatprep.subr.bf16.mxu1 %v3960_v56  ;;  %v4041_v53 = vld [vmem:[#allocation5 + $0x724] ss:$16 sps:$4 sm:$0xff]   ;;  %v4042_v56 = vld [vmem:[#allocation5 + $0x328] ss:$16 sps:$4 sm:$0xff]  }
  0xeb   :  { %2220 = vmatprep.subr.bf16.mxu0 %v3957_v55  ;;  %v4039_v55 = vld [vmem:[#allocation5 + $0x720] ss:$16 sps:$4 sm:$0xff]  }
  0xed   :  { %2385 = vmatpush1.bf16.msra.mxu1 %v3958_v58  ;;  %v4050_v58 = vld [vmem:[#allocation5 + $0x34c] ss:$16 sps:$4 sm:$0xff]  }
  0xee   :  { %2221 = vmatpush1.bf16.msra.mxu0 %v3955_v57  ;;  %2386 = vmatprep.subr.bf16.mxu1 %v3966_v60  ;;  %v4047_v57 = vld [vmem:[#allocation5 + $0x744] ss:$16 sps:$4 sm:$0xff]   ;;  %v4048_v60 = vld [vmem:[#allocation5 + $0x348] ss:$16 sps:$4 sm:$0xff]  }
  0xef   :  { %2222 = vmatprep.subr.bf16.mxu0 %v3963_v59  ;;  %v4045_v59 = vld [vmem:[#allocation5 + $0x740] ss:$16 sps:$4 sm:$0xff]  }
  0xf1   :  { %2387 = vmatpush1.bf16.msra.mxu1 %v3964_v62  ;;  %v4056_v62 = vld [vmem:[#allocation5 + $0x36c] ss:$16 sps:$4 sm:$0xff]  }
  0xf2   :  { %2223 = vmatpush1.bf16.msra.mxu0 %v3961_v61  ;;  %2388 = vmatprep.subr.bf16.mxu1 %v3972_v0  ;;  %v4053_v61 = vld [vmem:[#allocation5 + $0x764] ss:$16 sps:$4 sm:$0xff]   ;;  %v4054_v0 = vld [vmem:[#allocation5 + $0x368] ss:$16 sps:$4 sm:$0xff]  }
  0xf3   :  { %2224 = vmatprep.subr.bf16.mxu0 %v3969_v63  ;;  %v4051_v63 = vld [vmem:[#allocation5 + $0x760] ss:$16 sps:$4 sm:$0xff]  }
  0xf5   :  { %2389 = vmatpush1.bf16.msra.mxu1 %v3970_v2  ;;  %v4062_v2 = vld [vmem:[#allocation5 + $0x38c] ss:$16 sps:$4 sm:$0xff]  }
  0xf6   :  { %2225 = vmatpush1.bf16.msra.mxu0 %v3967_v1  ;;  %2390 = vmatprep.subr.bf16.mxu1 %v3978_v4  ;;  %v4059_v1 = vld [vmem:[#allocation5 + $0x784] ss:$16 sps:$4 sm:$0xff]   ;;  %v4060_v4 = vld [vmem:[#allocation5 + $0x388] ss:$16 sps:$4 sm:$0xff]  }
  0xf7   :  { %2226 = vmatprep.subr.bf16.mxu0 %v3975_v3  ;;  %v4057_v3 = vld [vmem:[#allocation5 + $0x780] ss:$16 sps:$4 sm:$0xff]  }
  0xf9   :  { %2391 = vmatpush1.bf16.msra.mxu1 %v3976_v6  ;;  %v4068_v6 = vld [vmem:[#allocation5 + $0x3ac] ss:$16 sps:$4 sm:$0xff]  }
  0xfa   :  { %2227 = vmatpush1.bf16.msra.mxu0 %v3973_v5  ;;  %2392 = vmatprep.subr.bf16.mxu1 %v3984_v9  ;;  %v4065_v5 = vld [vmem:[#allocation5 + $0x7a4] ss:$16 sps:$4 sm:$0xff]   ;;  %v4066_v9 = vld [vmem:[#allocation5 + $0x3a8] ss:$16 sps:$4 sm:$0xff]  }
  0xfb   :  { %2228 = vmatprep.subr.bf16.mxu0 %v3981_v7  ;;  %v4063_v7 = vld [vmem:[#allocation5 + $0x7a0] ss:$16 sps:$4 sm:$0xff]  }
  0xfd   :  { %2393 = vmatpush1.bf16.msra.mxu1 %v3982_v12  ;;  %v4074_v12 = vld [vmem:[#allocation5 + $0x3cc] ss:$16 sps:$4 sm:$0xff]  }
  0xfe   :  { %2229 = vmatpush1.bf16.msra.mxu0 %v3979_v10  ;;  %2403 = vmatprep.subr.bf16.mxu1 %v3990_v15  ;;  %v4071_v10 = vld [vmem:[#allocation5 + $0x7c4] ss:$16 sps:$4 sm:$0xff]  }
  0xff   :  { %2239 = vmatprep.subr.bf16.mxu0 %v3987_v14  ;;  %v4072_v14 = vld [vmem:[#allocation5 + $0x3c8] ss:$16 sps:$4 sm:$0xff]   ;;  %v4077_v15 = vld [vmem:[#allocation5 + $0x7e4] ss:$16 sps:$4 sm:$0xff]  }
 0x100   :  { %2395 = vmatmul.mubr.bf16.vlgmr.msra.gmra.mrb[4].mxu1 %v4726_v8  ;;  %v4008_v8 = vld [vmem:[#allocation5 + $0x26c] ss:$16 sps:$4 sm:$0xff]  }
 0x101   :  { %2231 = vmatmul.mubr.bf16.vlgmr.msra.gmra.mrb[0].mxu0 %v4736_v16  ;;  %2404 = vmatpush1.bf16.msra.mxu1 %v3988_v18  ;;  %v4075_v18 = vld [vmem:[#allocation5 + $0x7e0] ss:$16 sps:$4 sm:$0xff]  }
 0x102   :  { %2240 = vmatpush1.bf16.msra.mxu0 %v3985_v17  ;;  %2405 = vmatprep.subr.bf16.mxu1 %v3996_v20  ;;  %v4080_v17 = vld [vmem:[#allocation5 + $0x3ec] ss:$16 sps:$4 sm:$0xff]   ;;  %v4083_v20 = vld [vmem:[#allocation5 + $0x804] ss:$16 sps:$4 sm:$0xff]  }
 0x103   :  { %2241 = vmatprep.subr.bf16.mxu0 %v3993_v19  ;;  %2271 = vmatprep.mubr.bf16.mxu0 %v4740_v23  ;;  %v4078_v19 = vld [vmem:[#allocation5 + $0x3e8] ss:$16 sps:$4 sm:$0xff]  }
 0x104   :  { %2435 = vmatprep.mubr.bf16.mxu1 %v4722_v52  ;;  %v4017_v52 = vld [vmem:[#allocation5 + $0x6a4] ss:$16 sps:$4 sm:$0xff]  }
 0x105   :  { %2406 = vmatpush1.bf16.msra.mxu1 %v3994_v24  ;;  %v4081_v24 = vld [vmem:[#allocation5 + $0x800] ss:$16 sps:$4 sm:$0xff]  }
 0x106   :  { %2242 = vmatpush1.bf16.msra.mxu0 %v3991_v22  ;;  %2407 = vmatprep.subr.bf16.mxu1 %v4002_v26  ;;  %v4086_v22 = vld [vmem:[#allocation5 + $0x40c] ss:$16 sps:$4 sm:$0xff]   ;;  %v4744_v26 = vpack.c.bf16 %v121_v21, %v121_v21  ;;  %v4168_v21 = vld [vmem:[#allocation5 + $0x5c8] ss:$16 sps:$4 sm:$0xff]  }
 0x107   :  { %2243 = vmatprep.subr.bf16.mxu0 %v3999_v25  ;;  %v4084_v25 = vld [vmem:[#allocation5 + $0x408] ss:$16 sps:$4 sm:$0xff]  }
 0x109   :  { %2408 = vmatpush1.bf16.msra.mxu1 %v4000_v28  ;;  %v4089_v28 = vld [vmem:[#allocation5 + $0x824] ss:$16 sps:$4 sm:$0xff]  }
 0x10a   :  { %2244 = vmatpush1.bf16.msra.mxu0 %v3997_v27  ;;  %2409 = vmatprep.subr.bf16.mxu1 %v4008_v8  ;;  %v124_v27 = vld [vmem:[#allocation2 + $0x48] sm:$0xff] }
 0x10b   :  { %2245 = vmatprep.subr.bf16.mxu0 %v4005_v29  ;;  %v4092_v29 = vld [vmem:[#allocation5 + $0x42c] ss:$16 sps:$4 sm:$0xff]   ;;  %v4746_v8 = vpack.c.bf16 %v124_v27, %v124_v27  ;;  %v4174_v27 = vld [vmem:[#allocation5 + $0x5e8] ss:$16 sps:$4 sm:$0xff]  }
 0x10d   :  { %2410 = vmatpush1.bf16.msra.mxu1 %v4006_v31  ;;  %v4090_v31 = vld [vmem:[#allocation5 + $0x428] ss:$16 sps:$4 sm:$0xff]  }
 0x10e   :  { %2246 = vmatpush1.bf16.msra.mxu0 %v4003_v30  ;;  %2411 = vmatprep.subr.bf16.mxu1 %v4014_v33  ;;  %v4087_v30 = vld [vmem:[#allocation5 + $0x820] ss:$16 sps:$4 sm:$0xff]   ;;  %v4098_v33 = vld [vmem:[#allocation5 + $0x44c] ss:$16 sps:$4 sm:$0xff]  }
 0x10f   :  { %2247 = vmatprep.subr.bf16.mxu0 %v4011_v32  ;;  %v4095_v32 = vld [vmem:[#allocation5 + $0x844] ss:$16 sps:$4 sm:$0xff]  }
 0x111   :  { %2412 = vmatpush1.bf16.msra.mxu1 %v4012_v35  ;;  %v4096_v35 = vld [vmem:[#allocation5 + $0x448] ss:$16 sps:$4 sm:$0xff]  }
 0x112   :  { %2248 = vmatpush1.bf16.msra.mxu0 %v4009_v34  ;;  %2413 = vmatprep.subr.bf16.mxu1 %v4020_v37  ;;  %v4093_v34 = vld [vmem:[#allocation5 + $0x840] ss:$16 sps:$4 sm:$0xff]  }
 0x113   :  { %2249 = vmatprep.subr.bf16.mxu0 %v4017_v52  ;;  %v4101_v52 = vld [vmem:[#allocation5 + $0x864] ss:$16 sps:$4 sm:$0xff]   ;;  %v4099_v37 = vld [vmem:[#allocation5 + $0x860] ss:$16 sps:$4 sm:$0xff]  }
 0x115   :  { %2414 = vmatpush1.bf16.msra.mxu1 %v4018_v39  ;;  %v4107_v39 = vld [vmem:[#allocation5 + $0x884] ss:$16 sps:$4 sm:$0xff]  }
 0x116   :  { %2250 = vmatpush1.bf16.msra.mxu0 %v4015_v38  ;;  %2415 = vmatprep.subr.bf16.mxu1 %v4026_v41  ;;  %v4102_v38 = vld [vmem:[#allocation5 + $0x468] ss:$16 sps:$4 sm:$0xff]   ;;  %v4105_v41 = vld [vmem:[#allocation5 + $0x880] ss:$16 sps:$4 sm:$0xff]  }
 0x117   :  { %2251 = vmatprep.subr.bf16.mxu0 %v4023_v40  ;;  %v4110_v40 = vld [vmem:[#allocation5 + $0x48c] ss:$16 sps:$4 sm:$0xff]  }
 0x119   :  { %2416 = vmatpush1.bf16.msra.mxu1 %v4024_v43  ;;  %v4116_v43 = vld [vmem:[#allocation5 + $0x4ac] ss:$16 sps:$4 sm:$0xff]  }
 0x11a   :  { %2252 = vmatpush1.bf16.msra.mxu0 %v4021_v42  ;;  %2417 = vmatprep.subr.bf16.mxu1 %v4032_v45  ;;  %v4108_v42 = vld [vmem:[#allocation5 + $0x488] ss:$16 sps:$4 sm:$0xff]  }
 0x11b   :  { %2253 = vmatprep.subr.bf16.mxu0 %v4029_v44  ;;  %v4111_v44 = vld [vmem:[#allocation5 + $0x8a0] ss:$16 sps:$4 sm:$0xff]   ;;  %v4114_v45 = vld [vmem:[#allocation5 + $0x4a8] ss:$16 sps:$4 sm:$0xff]  }
 0x11d   :  { %2418 = vmatpush1.bf16.msra.mxu1 %v4030_v47  ;;  %v4122_v47 = vld [vmem:[#allocation5 + $0x4cc] ss:$16 sps:$4 sm:$0xff]  }
 0x11e   :  { %2254 = vmatpush1.bf16.msra.mxu0 %v4027_v46  ;;  %2419 = vmatprep.subr.bf16.mxu1 %v4038_v49  ;;  %v4119_v46 = vld [vmem:[#allocation5 + $0x8c4] ss:$16 sps:$4 sm:$0xff]   ;;  %v4120_v49 = vld [vmem:[#allocation5 + $0x4c8] ss:$16 sps:$4 sm:$0xff]  }
 0x11f   :  { %2255 = vmatprep.subr.bf16.mxu0 %v4035_v48  ;;  %v4117_v48 = vld [vmem:[#allocation5 + $0x8c0] ss:$16 sps:$4 sm:$0xff]  }
 0x121   :  { %2420 = vmatpush1.bf16.msra.mxu1 %v4036_v51  ;;  %v4128_v51 = vld [vmem:[#allocation5 + $0x4ec] ss:$16 sps:$4 sm:$0xff]  }
 0x122   :  { %2256 = vmatpush1.bf16.msra.mxu0 %v4033_v50  ;;  %2421 = vmatprep.subr.bf16.mxu1 %v4044_v54  ;;  %v4125_v50 = vld [vmem:[#allocation5 + $0x8e4] ss:$16 sps:$4 sm:$0xff]   ;;  %v4126_v54 = vld [vmem:[#allocation5 + $0x4e8] ss:$16 sps:$4 sm:$0xff]  }
 0x123   :  { %2257 = vmatprep.subr.bf16.mxu0 %v4041_v53  ;;  %v4123_v53 = vld [vmem:[#allocation5 + $0x8e0] ss:$16 sps:$4 sm:$0xff]  }
 0x125   :  { %2422 = vmatpush1.bf16.msra.mxu1 %v4042_v56  ;;  %v4134_v56 = vld [vmem:[#allocation5 + $0x50c] ss:$16 sps:$4 sm:$0xff]  }
 0x126   :  { %2258 = vmatpush1.bf16.msra.mxu0 %v4039_v55  ;;  %2423 = vmatprep.subr.bf16.mxu1 %v4050_v58  ;;  %v4131_v55 = vld [vmem:[#allocation5 + $0x904] ss:$16 sps:$4 sm:$0xff]   ;;  %v4132_v58 = vld [vmem:[#allocation5 + $0x508] ss:$16 sps:$4 sm:$0xff]  }
 0x127   :  { %2259 = vmatprep.subr.bf16.mxu0 %v4047_v57  ;;  %v4129_v57 = vld [vmem:[#allocation5 + $0x900] ss:$16 sps:$4 sm:$0xff]  }
 0x129   :  { %2424 = vmatpush1.bf16.msra.mxu1 %v4048_v60  ;;  %v4140_v60 = vld [vmem:[#allocation5 + $0x52c] ss:$16 sps:$4 sm:$0xff]  }
 0x12a   :  { %2260 = vmatpush1.bf16.msra.mxu0 %v4045_v59  ;;  %2425 = vmatprep.subr.bf16.mxu1 %v4056_v62  ;;  %v4137_v59 = vld [vmem:[#allocation5 + $0x924] ss:$16 sps:$4 sm:$0xff]   ;;  %v4138_v62 = vld [vmem:[#allocation5 + $0x528] ss:$16 sps:$4 sm:$0xff]  }
 0x12b   :  { %2261 = vmatprep.subr.bf16.mxu0 %v4053_v61  ;;  %v4135_v61 = vld [vmem:[#allocation5 + $0x920] ss:$16 sps:$4 sm:$0xff]  }
 0x12d   :  { %2426 = vmatpush1.bf16.msra.mxu1 %v4054_v0  ;;  %v4146_v0 = vld [vmem:[#allocation5 + $0x54c] ss:$16 sps:$4 sm:$0xff]  }
 0x12e   :  { %2262 = vmatpush1.bf16.msra.mxu0 %v4051_v63  ;;  %2427 = vmatprep.subr.bf16.mxu1 %v4062_v2  ;;  %v4143_v63 = vld [vmem:[#allocation5 + $0x944] ss:$16 sps:$4 sm:$0xff]   ;;  %v4144_v2 = vld [vmem:[#allocation5 + $0x548] ss:$16 sps:$4 sm:$0xff]  }
 0x12f   :  { %2263 = vmatprep.subr.bf16.mxu0 %v4059_v1  ;;  %v4141_v1 = vld [vmem:[#allocation5 + $0x940] ss:$16 sps:$4 sm:$0xff]  }
 0x131   :  { %2428 = vmatpush1.bf16.msra.mxu1 %v4060_v4  ;;  %v4152_v4 = vld [vmem:[#allocation5 + $0x56c] ss:$16 sps:$4 sm:$0xff]  }
 0x132   :  { %2264 = vmatpush1.bf16.msra.mxu0 %v4057_v3  ;;  %2429 = vmatprep.subr.bf16.mxu1 %v4068_v6  ;;  %v4149_v3 = vld [vmem:[#allocation5 + $0x964] ss:$16 sps:$4 sm:$0xff]   ;;  %v4150_v6 = vld [vmem:[#allocation5 + $0x568] ss:$16 sps:$4 sm:$0xff]  }
 0x133   :  { %2265 = vmatprep.subr.bf16.mxu0 %v4065_v5  ;;  %v4147_v5 = vld [vmem:[#allocation5 + $0x960] ss:$16 sps:$4 sm:$0xff]  }
 0x135   :  { %2430 = vmatpush1.bf16.msra.mxu1 %v4066_v9  ;;  %v4158_v9 = vld [vmem:[#allocation5 + $0x58c] ss:$16 sps:$4 sm:$0xff]  }
 0x136   :  { %2266 = vmatpush1.bf16.msra.mxu0 %v4063_v7  ;;  %2431 = vmatprep.subr.bf16.mxu1 %v4074_v12  ;;  %v4155_v7 = vld [vmem:[#allocation5 + $0x984] ss:$16 sps:$4 sm:$0xff]   ;;  %v4156_v12 = vld [vmem:[#allocation5 + $0x588] ss:$16 sps:$4 sm:$0xff]  }
 0x137   :  { %2267 = vmatprep.subr.bf16.mxu0 %v4071_v10  ;;  %v4153_v10 = vld [vmem:[#allocation5 + $0x980] ss:$16 sps:$4 sm:$0xff]  }
 0x139   :  { %2432 = vmatpush1.bf16.msra.mxu1 %v4072_v14  ;;  %v4164_v14 = vld [vmem:[#allocation5 + $0x5ac] ss:$16 sps:$4 sm:$0xff]  }
 0x13a   :  { %2268 = vmatpush1.bf16.msra.mxu0 %v4069_v13  ;;  %2433 = vmatprep.subr.bf16.mxu1 %v4080_v17  ;;  %v4161_v13 = vld [vmem:[#allocation5 + $0x9a4] ss:$16 sps:$4 sm:$0xff]   ;;  %v4162_v17 = vld [vmem:[#allocation5 + $0x5a8] ss:$16 sps:$4 sm:$0xff]  }
 0x13b   :  { %2269 = vmatprep.subr.bf16.mxu0 %v4077_v15  ;;  %v4159_v15 = vld [vmem:[#allocation5 + $0x9a0] ss:$16 sps:$4 sm:$0xff]  }
 0x13d   :  { %2434 = vmatpush1.bf16.msra.mxu1 %v4078_v19  ;;  %v4170_v19 = vld [vmem:[#allocation5 + $0x5cc] ss:$16 sps:$4 sm:$0xff]  }
 0x13e   :  { %2270 = vmatpush1.bf16.msra.mxu0 %v4075_v18  ;;  %2444 = vmatprep.subr.bf16.mxu1 %v4086_v22  ;;  %v4167_v18 = vld [vmem:[#allocation5 + $0x9c4] ss:$16 sps:$4 sm:$0xff]  }
 0x13f   :  { %2280 = vmatprep.subr.bf16.mxu0 %v4083_v20  ;;  %v4165_v20 = vld [vmem:[#allocation5 + $0x9c0] ss:$16 sps:$4 sm:$0xff]   ;;  %v4173_v22 = vld [vmem:[#allocation5 + $0x9e4] ss:$16 sps:$4 sm:$0xff]  }
 0x140   :  { %2436 = vmatmul.mubr.bf16.vlgmr.msra.gmra.mrb[4].mxu1 %v4728_v11  ;;  %v4104_v11 = vld [vmem:[#allocation5 + $0x46c] ss:$16 sps:$4 sm:$0xff]  }
 0x141   :  { %2272 = vmatmul.mubr.bf16.vlgmr.msra.gmra.mrb[0].mxu0 %v4744_v26  ;;  %2445 = vmatpush1.bf16.msra.mxu1 %v4084_v25  ;;  %v4171_v25 = vld [vmem:[#allocation5 + $0x9e0] ss:$16 sps:$4 sm:$0xff]  }
 0x142   :  { %2281 = vmatpush1.bf16.msra.mxu0 %v4081_v24  ;;  %2446 = vmatprep.subr.bf16.mxu1 %v4092_v29  ;;  %v4176_v24 = vld [vmem:[#allocation5 + $0x5ec] ss:$16 sps:$4 sm:$0xff]  }
 0x143   :  { %2282 = vmatprep.subr.bf16.mxu0 %v4089_v28  ;;  %2312 = vmatprep.mubr.bf16.mxu0 %v4746_v8  ;;  %v123_v28 = vld [vmem:[#allocation2 + $0x40] sm:$0xff] }
 0x144   :  { %2476 = vmatprep.mubr.bf16.mxu1 %v4733_v36  ;;  %v4113_v36 = vld [vmem:[#allocation5 + $0x8a4] ss:$16 sps:$4 sm:$0xff]   ;;  %v4179_v29 = vld [vmem:[#allocation5 + $0x60c] ss:$16 sps:$4 sm:$0xff]  }
 0x145   :  { %2447 = vmatpush1.bf16.msra.mxu1 %v4090_v31  ;;  %v4188_v31 = vld [vmem:[#allocation5 + $0xa00] ss:$16 sps:$4 sm:$0x1f]  }
 0x146   :  { %2283 = vmatpush1.bf16.msra.mxu0 %v4087_v30  ;;  %2448 = vmatprep.subr.bf16.mxu1 %v4098_v33  ;;  %v4183_v30 = vld [vmem:[#allocation5 + $0xa04] ss:$16 sps:$4 sm:$0x1f]   ;;  %v4177_v33 = vld [vmem:[#allocation5 + $0x608] ss:$16 sps:$4 sm:$0xff]  }
 0x147   :  { %2284 = vmatprep.subr.bf16.mxu0 %v4095_v32  ;;  %v4752_v32 = vpack.c.bf16 %v123_v28, %v123_v28  ;;  %v4308_v28 = vld [vmem:[#allocation8 + $0x94] ss:$8 sps:$4 sm:$0xff]  }
 0x149   :  { %2449 = vmatpush1.bf16.msra.mxu1 %v4096_v35  ;;  %v2105_v35 = vsel %vm2103_vm0, %v4188_v31, 0  ;;  %v4227_v31 = vld [vmem:[#allocation5 + $0x7ec] ss:$16 sps:$4 sm:$0xff]  }
 0x14a   :  { %2285 = vmatpush1.bf16.msra.mxu0 %v4093_v34  ;;  %2450 = vmatprep.subr.bf16.mxu1 %v4104_v11  ;;  %v4182_v34 = vld [vmem:[#allocation5 + $0x62c] ss:$16 sps:$4 sm:$0xff]   ;;  %v4180_v11 = vld [vmem:[#allocation5 + $0x628] ss:$16 sps:$4 sm:$0xff]  }
 0x14b   :  { %2286 = vmatprep.subr.bf16.mxu0 %v4101_v52  ;;  %v4273_v52 = vld [vmem:[#allocation5 + $0xa0c] ss:$16 sps:$4 sm:$0x1f]  }
 0x14d   :  { %2451 = vmatpush1.bf16.msra.mxu1 %v4102_v38  ;;  %v4594_v38 = vmov 0  }
 0x14e   :  { %2287 = vmatpush1.bf16.msra.mxu0 %v4099_v37  ;;  %2452 = vmatprep.subr.bf16.mxu1 %v4110_v40  ;;  %v4187_v37 = vld [vmem:[#allocation5 + $0x64c] ss:$16 sps:$4 sm:$0xff]  }
 0x14f   :  { %2288 = vmatprep.subr.bf16.mxu0 %v4107_v39  ;;  %v4185_v39 = vld [vmem:[#allocation5 + $0x648] ss:$16 sps:$4 sm:$0xff]  }
 0x150   :  { %v125_v40 = vld [vmem:[#allocation2 + $0x50] sm:$0xff] }
 0x151   :  { %2453 = vmatpush1.bf16.msra.mxu1 %v4108_v42  ;;  %v4275_v42 = vld [vmem:[#allocation5 + $0xa08] ss:$16 sps:$4 sm:$0x1f]  }
 0x152   :  { %2289 = vmatpush1.bf16.msra.mxu0 %v4105_v41  ;;  %2454 = vmatprep.subr.bf16.mxu1 %v4116_v43  ;;  %v4191_v41 = vld [vmem:[#allocation5 + $0x66c] ss:$16 sps:$4 sm:$0xff]  }
 0x153   :  { %2290 = vmatprep.subr.bf16.mxu0 %v4113_v36  ;;  %v136_v36 = vpack.c.bf16 %v125_v40, %v125_v40  ;;  %v4194_v43 = vld [vmem:[#allocation5 + $0x68c] ss:$16 sps:$4 sm:$0xff]   ;;  %v4317_v40 = vld [vmem:[#allocation8 + $0xc4] ss:$8 sps:$4 sm:$0xff]  }
 0x155   :  { %2455 = vmatpush1.bf16.msra.mxu1 %v4114_v45  ;;  %v4281_v45 = vld [vmem:[#allocation8 + $0x4] ss:$8 sps:$4 sm:$0xff]  }
 0x156   :  { %2291 = vmatpush1.bf16.msra.mxu0 %v4111_v44  ;;  %2456 = vmatprep.subr.bf16.mxu1 %v4122_v47  ;;  %v2111_v44 = vsel %vm2103_vm0, %v4275_v42, 0  ;;  %v4195_v47 = vld [vmem:[#allocation5 + $0x6a8] ss:$16 sps:$4 sm:$0xff]   ;;  %v4236_v42 = vld [vmem:[#allocation5 + $0x84c] ss:$16 sps:$4 sm:$0xff]  }
 0x157   :  { %2292 = vmatprep.subr.bf16.mxu0 %v4119_v46  ;;  %v4197_v46 = vld [vmem:[#allocation5 + $0x6ac] ss:$16 sps:$4 sm:$0xff]  }
 0x159   :  { %2457 = vmatpush1.bf16.msra.mxu1 %v4120_v49  ;;  %v4200_v49 = vld [vmem:[#allocation5 + $0x6cc] ss:$16 sps:$4 sm:$0xff]  }
 0x15a   :  { %2293 = vmatpush1.bf16.msra.mxu0 %v4117_v48  ;;  %2458 = vmatprep.subr.bf16.mxu1 %v4128_v51  ;;  %v4279_v48 = vld [vmem:[#allocation8] ss:$8 sps:$4 sm:$0xff]  }
 0x15b   :  { %2294 = vmatprep.subr.bf16.mxu0 %v4125_v50  ;;  %v4284_v50 = vld [vmem:[#allocation8 + $0x14] ss:$8 sps:$4 sm:$0xff]  }
 0x15d   :  { %2459 = vmatpush1.bf16.msra.mxu1 %v4126_v54 }
 0x15e   :  { %2295 = vmatpush1.bf16.msra.mxu0 %v4123_v53  ;;  %2460 = vmatprep.subr.bf16.mxu1 %v4134_v56  ;;  %v4282_v56 = vld [vmem:[#allocation8 + $0x10] ss:$8 sps:$4 sm:$0xff]  }
 0x15f   :  { %2296 = vmatprep.subr.bf16.mxu0 %v4131_v55  ;;  %v4198_v55 = vld [vmem:[#allocation5 + $0x6c8] ss:$16 sps:$4 sm:$0xff]  }
 0x161   :  { %2461 = vmatpush1.bf16.msra.mxu1 %v4132_v58  ;;  %v4203_v58 = vld [vmem:[#allocation5 + $0x6ec] ss:$16 sps:$4 sm:$0xff]  }
 0x162   :  { %2297 = vmatpush1.bf16.msra.mxu0 %v4129_v57  ;;  %2462 = vmatprep.subr.bf16.mxu1 %v4140_v60  ;;  %v4201_v60 = vld [vmem:[#allocation5 + $0x6e8] ss:$16 sps:$4 sm:$0xff]  }
 0x163   :  { %2298 = vmatprep.subr.bf16.mxu0 %v4137_v59  ;;  %v4287_v59 = vld [vmem:[#allocation8 + $0x24] ss:$8 sps:$4 sm:$0xff]  }
 0x165   :  { %2463 = vmatpush1.bf16.msra.mxu1 %v4138_v62  ;;  %v4206_v62 = vld [vmem:[#allocation5 + $0x70c] ss:$16 sps:$4 sm:$0xff]  }
 0x166   :  { %2299 = vmatpush1.bf16.msra.mxu0 %v4135_v61  ;;  %2464 = vmatprep.subr.bf16.mxu1 %v4146_v0  ;;  %v4285_v61 = vld [vmem:[#allocation8 + $0x20] ss:$8 sps:$4 sm:$0xff]   ;;  %v4204_v0 = vld [vmem:[#allocation5 + $0x708] ss:$16 sps:$4 sm:$0xff]  }
 0x167   :  { %2300 = vmatprep.subr.bf16.mxu0 %v4143_v63  ;;  %v4290_v63 = vld [vmem:[#allocation8 + $0x34] ss:$8 sps:$4 sm:$0xff]  }
 0x169   :  { %2465 = vmatpush1.bf16.msra.mxu1 %v4144_v2  ;;  %v4209_v2 = vld [vmem:[#allocation5 + $0x72c] ss:$16 sps:$4 sm:$0xff]  }
 0x16a   :  { %2301 = vmatpush1.bf16.msra.mxu0 %v4141_v1  ;;  %2466 = vmatprep.subr.bf16.mxu1 %v4152_v4  ;;  %v4288_v1 = vld [vmem:[#allocation8 + $0x30] ss:$8 sps:$4 sm:$0xff]   ;;  %v4207_v4 = vld [vmem:[#allocation5 + $0x728] ss:$16 sps:$4 sm:$0xff]  }
 0x16b   :  { %2302 = vmatprep.subr.bf16.mxu0 %v4149_v3  ;;  %v4293_v3 = vld [vmem:[#allocation8 + $0x44] ss:$8 sps:$4 sm:$0xff]  }
 0x16d   :  { %2467 = vmatpush1.bf16.msra.mxu1 %v4150_v6  ;;  %v4212_v6 = vld [vmem:[#allocation5 + $0x74c] ss:$16 sps:$4 sm:$0xff]  }
 0x16e   :  { %2303 = vmatpush1.bf16.msra.mxu0 %v4147_v5  ;;  %2468 = vmatprep.subr.bf16.mxu1 %v4158_v9  ;;  %v4291_v5 = vld [vmem:[#allocation8 + $0x40] ss:$8 sps:$4 sm:$0xff]   ;;  %v4210_v9 = vld [vmem:[#allocation5 + $0x748] ss:$16 sps:$4 sm:$0xff]  }
 0x16f   :  { %2304 = vmatprep.subr.bf16.mxu0 %v4155_v7  ;;  %v4296_v7 = vld [vmem:[#allocation8 + $0x54] ss:$8 sps:$4 sm:$0xff]  }
 0x171   :  { %2469 = vmatpush1.bf16.msra.mxu1 %v4156_v12  ;;  %v4215_v12 = vld [vmem:[#allocation5 + $0x76c] ss:$16 sps:$4 sm:$0xff]  }
 0x172   :  { %2305 = vmatpush1.bf16.msra.mxu0 %v4153_v10  ;;  %2470 = vmatprep.subr.bf16.mxu1 %v4164_v14  ;;  %v4294_v10 = vld [vmem:[#allocation8 + $0x50] ss:$8 sps:$4 sm:$0xff]   ;;  %v4213_v14 = vld [vmem:[#allocation5 + $0x768] ss:$16 sps:$4 sm:$0xff]  }
 0x173   :  { %2306 = vmatprep.subr.bf16.mxu0 %v4161_v13  ;;  %v4299_v13 = vld [vmem:[#allocation8 + $0x64] ss:$8 sps:$4 sm:$0xff]  }
 0x175   :  { %2471 = vmatpush1.bf16.msra.mxu1 %v4162_v17  ;;  %v4218_v17 = vld [vmem:[#allocation5 + $0x78c] ss:$16 sps:$4 sm:$0xff]  }
 0x176   :  { %2307 = vmatpush1.bf16.msra.mxu0 %v4159_v15  ;;  %2472 = vmatprep.subr.bf16.mxu1 %v4170_v19  ;;  %v4297_v15 = vld [vmem:[#allocation8 + $0x60] ss:$8 sps:$4 sm:$0xff]   ;;  %v4216_v19 = vld [vmem:[#allocation5 + $0x788] ss:$16 sps:$4 sm:$0xff]  }
 0x177   :  { %2308 = vmatprep.subr.bf16.mxu0 %v4167_v18  ;;  %v4302_v18 = vld [vmem:[#allocation8 + $0x74] ss:$8 sps:$4 sm:$0xff]  }
 0x179   :  { %2473 = vmatpush1.bf16.msra.mxu1 %v4168_v21  ;;  %v4221_v21 = vld [vmem:[#allocation5 + $0x7ac] ss:$16 sps:$4 sm:$0xff]  }
 0x17a   :  { %2309 = vmatpush1.bf16.msra.mxu0 %v4165_v20  ;;  %2474 = vmatprep.subr.bf16.mxu1 %v4176_v24  ;;  %v4300_v20 = vld [vmem:[#allocation8 + $0x70] ss:$8 sps:$4 sm:$0xff]   ;;  %v4219_v24 = vld [vmem:[#allocation5 + $0x7a8] ss:$16 sps:$4 sm:$0xff]  }
 0x17b   :  { %2310 = vmatprep.subr.bf16.mxu0 %v4173_v22  ;;  %v4305_v22 = vld [vmem:[#allocation8 + $0x84] ss:$8 sps:$4 sm:$0xff]  }
 0x17d   :  { %2475 = vmatpush1.bf16.msra.mxu1 %v4174_v27  ;;  %v4224_v27 = vld [vmem:[#allocation5 + $0x7cc] ss:$16 sps:$4 sm:$0xff]  }
 0x17e   :  { %2311 = vmatpush1.bf16.msra.mxu0 %v4171_v25  ;;  %2485 = vmatprep.subr.bf16.mxu1 %v4179_v29  ;;  %v4303_v25 = vld [vmem:[#allocation8 + $0x80] ss:$8 sps:$4 sm:$0xff]   ;;  %v4222_v29 = vld [vmem:[#allocation5 + $0x7c8] ss:$16 sps:$4 sm:$0xff]  }
 0x17f   :  { %3625 = vmatprep.subr.msk.bf16.mxu0 %vm2103_vm0, %v4183_v30  ;;  %v4306_v30 = vld [vmem:[#allocation8 + $0x90] ss:$8 sps:$4 sm:$0xff]  }
 0x180   :  { %2477 = vmatmul.mubr.bf16.vlgmr.msra.gmra.mrb[4].mxu1 %v4736_v16  ;;  %v4189_v16 = vld [vmem:[#allocation5 + $0x668] ss:$16 sps:$4 sm:$0xff]  }
 0x181   :  { %2313 = vmatmul.mubr.bf16.vlgmr.msra.gmra.mrb[0].mxu0 %v4752_v32  ;;  %2486 = vmatpush1.bf16.msra.mxu1 %v4177_v33  ;;  %v4311_v33 = vld [vmem:[#allocation8 + $0xa4] ss:$8 sps:$4 sm:$0xff]  }
 0x182   :  { %2322 = vmatpush1.bf16.msra.mxu0 %v2105_v35  ;;  %2487 = vmatprep.subr.bf16.mxu1 %v4182_v34  ;;  %v4225_v34 = vld [vmem:[#allocation5 + $0x7e8] ss:$16 sps:$4 sm:$0xff]   ;;  %v4309_v35 = vld [vmem:[#allocation8 + $0xa0] ss:$8 sps:$4 sm:$0xff]  }
 0x183   :  { %2353 = vmatprep.mubr.bf16.mxu0 %v4594_v38  ;;  %2517 = vmatprep.mubr.bf16.mxu1 %v4740_v23  ;;  %v4192_v23 = vld [vmem:[#allocation5 + $0x688] ss:$16 sps:$4 sm:$0xff]  }
 0x184   :  { %3627 = vmatprep.subr.msk.bf16.mxu0 %vm2103_vm0, %v4273_v52  ;;  %v4230_v52 = vld [vmem:[#allocation5 + $0x80c] ss:$16 sps:$4 sm:$0xff]  }
 0x185   :  { %2488 = vmatpush1.bf16.msra.mxu1 %v4180_v11  ;;  %v4314_v11 = vld [vmem:[#allocation8 + $0xb4] ss:$8 sps:$4 sm:$0xff]  }
 0x186   :  { %2489 = vmatprep.subr.bf16.mxu1 %v4187_v37  ;;  %v4228_v37 = vld [vmem:[#allocation5 + $0x808] ss:$16 sps:$4 sm:$0xff]  }
 0x189   :  { %2490 = vmatpush1.bf16.msra.mxu1 %v4185_v39  ;;  %v4312_v39 = vld [vmem:[#allocation8 + $0xb0] ss:$8 sps:$4 sm:$0xff]  }
 0x18a   :  { %2491 = vmatprep.subr.bf16.mxu1 %v4191_v41  ;;  %v4231_v41 = vld [vmem:[#allocation5 + $0x828] ss:$16 sps:$4 sm:$0xff]  }
 0x18d   :  { %3626 = vmatmul.mubr.msk.bf16.vlgmr.msra.gmra.mrb[0].mxu0 %vm2099_vm1, %v136_v36  ;;  %2492 = vmatpush1.bf16.msra.mxu1 %v4189_v16  ;;  %v4320_v16 = vld [vmem:[#allocation8 + $0xd4] ss:$8 sps:$4 sm:$0xff]  }
 0x18e   :  { %2568 = vmatpush1.bf16.msra.mxu0 %v2111_v44  ;;  %2493 = vmatprep.subr.bf16.mxu1 %v4194_v43  ;;  %v4234_v43 = vld [vmem:[#allocation5 + $0x848] ss:$16 sps:$4 sm:$0xff]   ;;  %v4239_v44 = vld [vmem:[#allocation5 + $0x86c] ss:$16 sps:$4 sm:$0xff]  }
 0x18f   :  { %2599 = vmatprep.mubr.bf16.mxu0 %v4594_v38  ;;  %3012 = vmatprep.subr.bf16.mxu0 %v4281_v45  ;;  %v4233_v38 = vld [vmem:[#allocation5 + $0x82c] ss:$16 sps:$4 sm:$0xff]  }
 0x190   :  { %v4318_v45 = vld [vmem:[#allocation8 + $0xd0] ss:$8 sps:$4 sm:$0xff]  }
 0x191   :  { %2494 = vmatpush1.bf16.msra.mxu1 %v4192_v23  ;;  %v4237_v23 = vld [vmem:[#allocation5 + $0x868] ss:$16 sps:$4 sm:$0xff]  }
 0x192   :  { %2495 = vmatprep.subr.bf16.mxu1 %v4197_v46  ;;  %v4245_v46 = vld [vmem:[#allocation5 + $0x8ac] ss:$16 sps:$4 sm:$0xff]  }
 0x193   :  { %v4762_v51 = vpop.f32.mrb[0].mxu1 }
 0x194   :  { %v4764_v53 = vpop.f32.mrb[1].mxu1 }
 0x195   :  { %3628 = vmatmul.mubr.msk.bf16.vlgmr.msra.gmra.mrb[4].mxu0 %vm2099_vm1, %v136_v36  ;;  %v2154_v54 = vpop.f32.mrb[2].mxu1  ;;  %2496 = vmatpush1.bf16.msra.mxu1 %v4195_v47  ;;  %v4315_v36 = vld [vmem:[#allocation8 + $0xc0] ss:$8 sps:$4 sm:$0xff]   ;;  %v4243_v47 = vld [vmem:[#allocation5 + $0x8a8] ss:$16 sps:$4 sm:$0xff]  }
 0x196   :  { %3013 = vmatpush1.bf16.msra.mxu0 %v4279_v48  ;;  %v2155_v57 = vpop.f32.mrb[3].mxu1  ;;  %2497 = vmatprep.subr.bf16.mxu1 %v4200_v49  ;;  %v4248_v48 = vld [vmem:[#allocation5 + $0x8cc] ss:$16 sps:$4 sm:$0xff]   ;;  %v4246_v49 = vld [vmem:[#allocation5 + $0x8c8] ss:$16 sps:$4 sm:$0xff]  }
 0x197   :  { %3014 = vmatprep.subr.bf16.mxu0 %v4284_v50  ;;  %v4251_v50 = vld [vmem:[#allocation5 + $0x8ec] ss:$16 sps:$4 sm:$0xff]   ;;  %v4249_v54 = vld [vmem:[#allocation5 + $0x8e8] ss:$16 sps:$4 sm:$0xff]  }
 0x198   :  { %v4257_v57 = vld [vmem:[#allocation5 + $0x92c] ss:$16 sps:$4 sm:$0xff]  }
 0x199   :  { %2498 = vmatpush1.bf16.msra.mxu1 %v4198_v55  ;;  %v4254_v55 = vld [vmem:[#allocation5 + $0x90c] ss:$16 sps:$4 sm:$0xff]  }
 0x19a   :  { %3015 = vmatpush1.bf16.msra.mxu0 %v4282_v56  ;;  %2499 = vmatprep.subr.bf16.mxu1 %v4203_v58  ;;  %v4252_v56 = vld [vmem:[#allocation5 + $0x908] ss:$16 sps:$4 sm:$0xff]  }
 0x19b   :  { %3016 = vmatprep.subr.bf16.mxu0 %v4287_v59  ;;  %v4323_v58 = vld [vmem:[#allocation8 + $0xe4] ss:$8 sps:$4 sm:$0xff]   ;;  %v4321_v59 = vld [vmem:[#allocation8 + $0xe0] ss:$8 sps:$4 sm:$0xff]  }
 0x19d   :  { %2500 = vmatpush1.bf16.msra.mxu1 %v4201_v60  ;;  %v4255_v60 = vld [vmem:[#allocation5 + $0x928] ss:$16 sps:$4 sm:$0xff]  }
 0x19e   :  { %3017 = vmatpush1.bf16.msra.mxu0 %v4285_v61  ;;  %2501 = vmatprep.subr.bf16.mxu1 %v4206_v62  ;;  %v4260_v61 = vld [vmem:[#allocation5 + $0x94c] ss:$16 sps:$4 sm:$0xff]   ;;  %v4326_v62 = vld [vmem:[#allocation8 + $0xf4] ss:$8 sps:$4 sm:$0xff]  }
 0x19f   :  { %3018 = vmatprep.subr.bf16.mxu0 %v4290_v63  ;;  %v4324_v63 = vld [vmem:[#allocation8 + $0xf0] ss:$8 sps:$4 sm:$0xff]  }
 0x1a1   :  { %2502 = vmatpush1.bf16.msra.mxu1 %v4204_v0  ;;  %v4258_v0 = vld [vmem:[#allocation5 + $0x948] ss:$16 sps:$4 sm:$0xff]  }
 0x1a2   :  { %3019 = vmatpush1.bf16.msra.mxu0 %v4288_v1  ;;  %2503 = vmatprep.subr.bf16.mxu1 %v4209_v2  ;;  %v4263_v1 = vld [vmem:[#allocation5 + $0x96c] ss:$16 sps:$4 sm:$0xff]   ;;  %v4329_v2 = vld [vmem:[#allocation8 + $0x104] ss:$8 sps:$4 sm:$0xff]  }
 0x1a3   :  { %3020 = vmatprep.subr.bf16.mxu0 %v4293_v3  ;;  %v4261_v3 = vld [vmem:[#allocation5 + $0x968] ss:$16 sps:$4 sm:$0xff]  }
 0x1a5   :  { %2504 = vmatpush1.bf16.msra.mxu1 %v4207_v4  ;;  %v4266_v4 = vld [vmem:[#allocation5 + $0x98c] ss:$16 sps:$4 sm:$0xff]  }
 0x1a6   :  { %3021 = vmatpush1.bf16.msra.mxu0 %v4291_v5  ;;  %2505 = vmatprep.subr.bf16.mxu1 %v4212_v6  ;;  %v4264_v5 = vld [vmem:[#allocation5 + $0x988] ss:$16 sps:$4 sm:$0xff]   ;;  %v4269_v6 = vld [vmem:[#allocation5 + $0x9ac] ss:$16 sps:$4 sm:$0xff]  }
 0x1a7   :  { %3022 = vmatprep.subr.bf16.mxu0 %v4296_v7  ;;  %v4267_v7 = vld [vmem:[#allocation5 + $0x9a8] ss:$16 sps:$4 sm:$0xff]  }
 0x1a9   :  { %2506 = vmatpush1.bf16.msra.mxu1 %v4210_v9  ;;  %v4272_v9 = vld [vmem:[#allocation5 + $0x9cc] ss:$16 sps:$4 sm:$0xff]  }
 0x1aa   :  { %3023 = vmatpush1.bf16.msra.mxu0 %v4294_v10  ;;  %2507 = vmatprep.subr.bf16.mxu1 %v4215_v12  ;;  %v4270_v10 = vld [vmem:[#allocation5 + $0x9c8] ss:$16 sps:$4 sm:$0xff]   ;;  %v4278_v12 = vld [vmem:[#allocation5 + $0x9ec] ss:$16 sps:$4 sm:$0xff]  }
 0x1ab   :  { %3024 = vmatprep.subr.bf16.mxu0 %v4299_v13  ;;  %v4276_v13 = vld [vmem:[#allocation5 + $0x9e8] ss:$16 sps:$4 sm:$0xff]  }
 0x1ad   :  { %2508 = vmatpush1.bf16.msra.mxu1 %v4213_v14  ;;  %v463_v14 = vlaneseq }
 0x1ae   :  { %3025 = vmatpush1.bf16.msra.mxu0 %v4297_v15  ;;  %2509 = vmatprep.subr.bf16.mxu1 %v4218_v17 }
 0x1af   :  { %3026 = vmatprep.subr.bf16.mxu0 %v4302_v18  ;;  %v4770_v15 = vshrl.u32 %v463_v14, 7  ;;  %v4773_v18 = vld [vmem:[#allocation7] sm:$0xf] }
 0x1b0   :  { %v4374_v14 = vld [vmem:[#allocation8 + $0x1f4] ss:$8 sps:$4 sm:$0xff]  }
 0x1b1   :  { %2510 = vmatpush1.bf16.msra.mxu1 %v4216_v19  ;;  %v465_v17 = vsub.s32 0, %v4770_v15  ;;  %v469_v19 = vsub.s32 1, %v4770_v15 }
 0x1b2   :  { %3027 = vmatpush1.bf16.msra.mxu0 %v4300_v20  ;;  %2511 = vmatprep.subr.bf16.mxu1 %v4221_v21 }
 0x1b3   :  { %3028 = vmatprep.subr.bf16.mxu0 %v4305_v22  ;;  %v466_v20 = vrot.slane %v4773_v18, %v465_v17  ;;  %v470_v21 = vrot.slane %v4773_v18, %v469_v19 }
 0x1b5   :  { %2512 = vmatpush1.bf16.msra.mxu1 %v4219_v24  ;;  %v2151_v22 = vadd.f32 %v4762_v51, %v466_v20  ;;  %v4376_v24 = vld [vmem:[#allocation11] sm:$0xff]   ;;  %v4372_v20 = vld [vmem:[#allocation8 + $0x1f0] ss:$8 sps:$4 sm:$0xff]  }
 0x1b6   :  { %3029 = vmatpush1.bf16.msra.mxu0 %v4303_v25  ;;  %2513 = vmatprep.subr.bf16.mxu1 %v4224_v27  ;;  %v4377_v25 = vld [vmem:[#allocation11 + $0x48] sm:$0xff]   ;;  %v2153_v27 = vadd.f32 %v4764_v53, %v470_v21  ;;  %v4381_v53 = vld [vmem:[#allocation11 + $0x58] sm:$0xff]   ;;  %v473_v21 = vsub.s32 2, %v4770_v15 }
 0x1b7   :  { %3030 = vmatprep.subr.bf16.mxu0 %v4308_v28  ;;  %v4327_v51 = vld [vmem:[#allocation8 + $0x100] ss:$8 sps:$4 sm:$0xff]  }
 0x1b9   :  { %2514 = vmatpush1.bf16.msra.mxu1 %v4222_v29 }
 0x1ba   :  { %3031 = vmatpush1.bf16.msra.mxu0 %v4306_v30  ;;  %2515 = vmatprep.subr.bf16.mxu1 %v4227_v31 }
 0x1bb   :  { %3032 = vmatprep.subr.bf16.mxu0 %v4311_v33 }
 0x1bd   :  { %2516 = vmatpush1.bf16.msra.mxu1 %v4225_v34  ;;  %v4378_v34 = vld [vmem:[#allocation11 + $0x8] sm:$0xff]  }
 0x1be   :  { %3033 = vmatpush1.bf16.msra.mxu0 %v4309_v35  ;;  %2526 = vmatprep.subr.bf16.mxu1 %v4230_v52 }
 0x1bf   :  { %3034 = vmatprep.subr.bf16.mxu0 %v4314_v11  ;;  %v4379_v11 = vld [vmem:[#allocation11 + $0x50] sm:$0xff]  }
 0x1c0   :  { %2518 = vmatmul.mubr.bf16.vlgmr.msra.gmra.mrb[4].mxu1 %v4744_v26  ;;  %v4242_v26 = vld [vmem:[#allocation5 + $0x88c] ss:$16 sps:$4 sm:$0xff]  }
 0x1c1   :  { %2527 = vmatpush1.bf16.msra.mxu1 %v4228_v37  ;;  %2558 = vmatprep.mubr.bf16.mxu1 %v4746_v8  ;;  %v4240_v8 = vld [vmem:[#allocation5 + $0x888] ss:$16 sps:$4 sm:$0xff]  }
 0x1c2   :  { %2528 = vmatprep.subr.bf16.mxu1 %v4233_v38  ;;  %3035 = vmatpush1.bf16.msra.mxu0 %v4312_v39  ;;  %v4380_v39 = vld [vmem:[#allocation11 + $0x10] sm:$0xff]  }
 0x1c3   :  { %3036 = vmatprep.subr.bf16.mxu0 %v4317_v40 }
 0x1c5   :  { %2529 = vmatpush1.bf16.msra.mxu1 %v4231_v41  ;;  %v4332_v41 = vld [vmem:[#allocation8 + $0x114] ss:$8 sps:$4 sm:$0xff]  }
 0x1c6   :  { %2530 = vmatprep.subr.bf16.mxu1 %v4236_v42  ;;  %3037 = vmatpush1.bf16.msra.mxu0 %v4315_v36 }
 0x1c7   :  { %3038 = vmatprep.subr.bf16.mxu0 %v4320_v16  ;;  %v4330_v16 = vld [vmem:[#allocation8 + $0x110] ss:$8 sps:$4 sm:$0xff]  }
 0x1c9   :  { %2531 = vmatpush1.bf16.msra.mxu1 %v4234_v43 }
 0x1ca   :  { %2532 = vmatprep.subr.bf16.mxu1 %v4239_v44  ;;  %3039 = vmatpush1.bf16.msra.mxu0 %v4318_v45  ;;  %v4382_v44 = vld [vmem:[#allocation11 + $0x18] sm:$0xff]   ;;  %v4335_v45 = vld [vmem:[#allocation8 + $0x124] ss:$8 sps:$4 sm:$0xff]  }
 0x1cb   :  { %3040 = vmatprep.subr.bf16.mxu0 %v4323_v58  ;;  %v4347_v58 = vld [vmem:[#allocation8 + $0x164] ss:$8 sps:$4 sm:$0xff]  }
 0x1cd   :  { %2533 = vmatpush1.bf16.msra.mxu1 %v4237_v23 }
 0x1ce   :  { %2534 = vmatprep.subr.bf16.mxu1 %v4242_v26  ;;  %3041 = vmatpush1.bf16.msra.mxu0 %v4321_v59  ;;  %v4383_v26 = vld [vmem:[#allocation11 + $0x60] sm:$0xff]  }
 0x1cf   :  { %3042 = vmatprep.subr.bf16.mxu0 %v4326_v62  ;;  %v4345_v59 = vld [vmem:[#allocation8 + $0x160] ss:$8 sps:$4 sm:$0xff]   ;;  %v4353_v62 = vld [vmem:[#allocation8 + $0x184] ss:$8 sps:$4 sm:$0xff]  }
 0x1d1   :  { %2535 = vmatpush1.bf16.msra.mxu1 %v4240_v8  ;;  %v4333_v8 = vld [vmem:[#allocation8 + $0x120] ss:$8 sps:$4 sm:$0xff]  }
 0x1d2   :  { %2536 = vmatprep.subr.bf16.mxu1 %v4245_v46  ;;  %3043 = vmatpush1.bf16.msra.mxu0 %v4324_v63  ;;  %v4384_v46 = vld [vmem:[#allocation11 + $0x20] sm:$0xff]  }
 0x1d3   :  { %3053 = vmatprep.subr.bf16.mxu0 %v4329_v2  ;;  %v4351_v63 = vld [vmem:[#allocation8 + $0x180] ss:$8 sps:$4 sm:$0xff]   ;;  %v4359_v2 = vld [vmem:[#allocation8 + $0x1a4] ss:$8 sps:$4 sm:$0xff]  }
 0x1d5   :  { %2537 = vmatpush1.bf16.msra.mxu1 %v4243_v47  ;;  %v4338_v47 = vld [vmem:[#allocation8 + $0x134] ss:$8 sps:$4 sm:$0xff]  }
 0x1d6   :  { %2538 = vmatprep.subr.bf16.mxu1 %v4248_v48  ;;  %v4385_v48 = vld [vmem:[#allocation11 + $0x68] sm:$0xff]  }
 0x1d9   :  { %2539 = vmatpush1.bf16.msra.mxu1 %v4246_v49  ;;  %v4336_v49 = vld [vmem:[#allocation8 + $0x130] ss:$8 sps:$4 sm:$0xff]  }
 0x1da   :  { %2540 = vmatprep.subr.bf16.mxu1 %v4251_v50  ;;  %v4386_v50 = vld [vmem:[#allocation11 + $0x28] sm:$0xff]  }
 0x1dd   :  { %2541 = vmatpush1.bf16.msra.mxu1 %v4249_v54  ;;  %v4341_v54 = vld [vmem:[#allocation8 + $0x144] ss:$8 sps:$4 sm:$0xff]  }
 0x1de   :  { %2542 = vmatprep.subr.bf16.mxu1 %v4254_v55  ;;  %v4339_v55 = vld [vmem:[#allocation8 + $0x140] ss:$8 sps:$4 sm:$0xff]  }
 0x1e1   :  { %2543 = vmatpush1.bf16.msra.mxu1 %v4252_v56  ;;  %v4344_v56 = vld [vmem:[#allocation8 + $0x154] ss:$8 sps:$4 sm:$0xff]  }
 0x1e2   :  { %2544 = vmatprep.subr.bf16.mxu1 %v4257_v57  ;;  %v4342_v57 = vld [vmem:[#allocation8 + $0x150] ss:$8 sps:$4 sm:$0xff]  }
 0x1e5   :  { %2545 = vmatpush1.bf16.msra.mxu1 %v4255_v60  ;;  %v4350_v60 = vld [vmem:[#allocation8 + $0x174] ss:$8 sps:$4 sm:$0xff]  }
 0x1e6   :  { %2546 = vmatprep.subr.bf16.mxu1 %v4260_v61  ;;  %v4348_v61 = vld [vmem:[#allocation8 + $0x170] ss:$8 sps:$4 sm:$0xff]  }
 0x1e9   :  { %2547 = vmatpush1.bf16.msra.mxu1 %v4258_v0  ;;  %v4356_v0 = vld [vmem:[#allocation8 + $0x194] ss:$8 sps:$4 sm:$0xff]  }
 0x1ea   :  { %2548 = vmatprep.subr.bf16.mxu1 %v4263_v1  ;;  %v4354_v1 = vld [vmem:[#allocation8 + $0x190] ss:$8 sps:$4 sm:$0xff]  }
 0x1ed   :  { %2549 = vmatpush1.bf16.msra.mxu1 %v4261_v3  ;;  %v4357_v3 = vld [vmem:[#allocation8 + $0x1a0] ss:$8 sps:$4 sm:$0xff]  }
 0x1ee   :  { %2550 = vmatprep.subr.bf16.mxu1 %v4266_v4  ;;  %v4362_v4 = vld [vmem:[#allocation8 + $0x1b4] ss:$8 sps:$4 sm:$0xff]  }
 0x1f1   :  { %2551 = vmatpush1.bf16.msra.mxu1 %v4264_v5  ;;  %v4360_v5 = vld [vmem:[#allocation8 + $0x1b0] ss:$8 sps:$4 sm:$0xff]  }
 0x1f2   :  { %2552 = vmatprep.subr.bf16.mxu1 %v4269_v6  ;;  %v4365_v6 = vld [vmem:[#allocation8 + $0x1c4] ss:$8 sps:$4 sm:$0xff]  }
 0x1f5   :  { %2553 = vmatpush1.bf16.msra.mxu1 %v4267_v7  ;;  %v4363_v7 = vld [vmem:[#allocation8 + $0x1c0] ss:$8 sps:$4 sm:$0xff]  }
 0x1f6   :  { %2554 = vmatprep.subr.bf16.mxu1 %v4272_v9  ;;  %v4368_v9 = vld [vmem:[#allocation8 + $0x1d4] ss:$8 sps:$4 sm:$0xff]  }
 0x1f9   :  { %2555 = vmatpush1.bf16.msra.mxu1 %v4270_v10  ;;  %v4366_v10 = vld [vmem:[#allocation8 + $0x1d0] ss:$8 sps:$4 sm:$0xff]  }
 0x1fa   :  { %2556 = vmatprep.subr.bf16.mxu1 %v4278_v12  ;;  %v4371_v12 = vld [vmem:[#allocation8 + $0x1e4] ss:$8 sps:$4 sm:$0xff]  }
 0x1fd   :  { %2557 = vmatpush1.bf16.msra.mxu1 %v4276_v13  ;;  %v4369_v13 = vld [vmem:[#allocation8 + $0x1e0] ss:$8 sps:$4 sm:$0xff]  }
 0x200   :  { %2559 = vmatmul.mubr.bf16.vlgmr.msra.gmra.mrb[4].mxu1 %v4752_v32  ;;  %v4375_v32 = vld [vmem:[#allocation11 + $0x40] sm:$0xff]  }
 0x201   :  { %3710 = vmatprep.subr.bf16.mxu1 %v4375_v32  ;;  %v474_v32 = vrot.slane %v4773_v18, %v473_v21 }
 0x202   :  { %3711 = vmatpush3.bf16.msra.mxu1 %v4376_v24 }
 0x203   :  { %3712 = vmatprep.subr.bf16.mxu1 %v4377_v25 }
 0x206   :  { %3713 = vmatpush3.bf16.msra.mxu1 %v4378_v34 }
 0x207   :  { %3714 = vmatprep.subr.bf16.mxu1 %v4379_v11 }
 0x20a   :  { %3715 = vmatpush3.bf16.msra.mxu1 %v4380_v39  ;;  %v4390_v39 = vld [vmem:[#allocation11 + $0x38] sm:$0xff]  }
 0x20b   :  { %3716 = vmatprep.subr.bf16.mxu1 %v4381_v53 }
 0x20e   :  { %3717 = vmatpush3.bf16.msra.mxu1 %v4382_v44 }
 0x20f   :  { %3718 = vmatprep.subr.bf16.mxu1 %v4383_v26 }
 0x212   :  { %3719 = vmatpush3.bf16.msra.mxu1 %v4384_v46 }
 0x213   :  { %3720 = vmatprep.subr.bf16.mxu1 %v4385_v48 }
 0x216   :  { %3721 = vmatpush3.bf16.msra.mxu1 %v4386_v50 }
 0x260   :  { %v2355_v28 = vpop.f32.mrb[0].mxu0 }
 0x261   :  { %v3733_v29 = vadd.f32 %v2355_v28, %v2151_v22  ;;  %v2357_v30 = vpop.f32.mrb[1].mxu0  ;;  %v477_v22 = vsub.s32 3, %v4770_v15 }
 0x262   :  { %v3735_v31 = vadd.f32 %v2357_v30, %v2153_v27  ;;  %v2359_v33 = vpop.f32.mrb[2].mxu0 }
 0x263   :  { %v2608_v35 = vmax.f32 %v3733_v29, 0.0  ;;  %v2360_v52 = vpop.f32.mrb[3].mxu0  ;;  %v478_v24 = vrot.slane %v4773_v18, %v477_v22  ;;  %v4389_v18 = vld [vmem:[#allocation11 + $0x78] sm:$0xff]  }
 0x264   :  { %v2609_v37 = vmax.f32 %v3735_v31, 0.0 }
 0x265   :  { %v2612_v40 = vpack.c.bf16 %v2608_v35, %v2608_v35 }
 0x266   :  { %v2613_v38 = vpack.c.bf16 %v2609_v37, %v2609_v37 }
 0x268   :  { %3044 = vmatprep.mubr.bf16.mxu0 %v2613_v38  ;;  %v4784_v42 = vpop.f32.mrb[4].mxu0  ;;  %v4387_v38 = vld [vmem:[#allocation11 + $0x70] sm:$0xff]  }
 0x269   :  { %3045 = vmatmul.mubr.bf16.vlgmr.msra.gmra.mrb[8].mxu0 %v2612_v40  ;;  %v4786_v36 = vpop.f32.mrb[5].mxu0  ;;  %3722 = vmatprep.subr.bf16.mxu1 %v4387_v38  ;;  %v2680_v40 = vld [vmem:[#allocation10] sm:$0x3] }
 0x26a   :  { %3054 = vmatpush1.bf16.msra.mxu0 %v4327_v51  ;;  %v2605_v43 = vpop.f32.mrb[6].mxu0  ;;  %v4388_v51 = vld [vmem:[#allocation11 + $0x30] sm:$0xff]   ;;  %v2689_v53 = vrot.slane %v2680_v40, %v469_v19 }
 0x26b   :  { %3055 = vmatprep.subr.bf16.mxu0 %v4332_v41  ;;  %v2606_v23 = vpop.f32.mrb[7].mxu0  ;;  %3723 = vmatpush3.bf16.msra.mxu1 %v4388_v51  ;;  %v2685_v41 = vrot.slane %v2680_v40, %v465_v17 }
 0x26c   :  { %3724 = vmatprep.subr.bf16.mxu1 %v4389_v18 }
 0x26e   :  { %3056 = vmatpush1.bf16.msra.mxu0 %v4330_v16 }
 0x26f   :  { %3057 = vmatprep.subr.bf16.mxu0 %v4335_v45  ;;  %3725 = vmatpush3.bf16.msra.mxu1 %v4390_v39 }
 0x272   :  { %3058 = vmatpush1.bf16.msra.mxu0 %v4333_v8 }
 0x273   :  { %3059 = vmatprep.subr.bf16.mxu0 %v4338_v47 }
 0x276   :  { %3060 = vmatpush1.bf16.msra.mxu0 %v4336_v49  ;;  %v3693_v49 = vld [vmem:[#allocation13] ss:$0 sm:$0xff] }
 0x277   :  { %3061 = vmatprep.subr.bf16.mxu0 %v4341_v54 }
 0x27a   :  { %3062 = vmatpush1.bf16.msra.mxu0 %v4339_v55 }
 0x27b   :  { %3063 = vmatprep.subr.bf16.mxu0 %v4344_v56 }
 0x27e   :  { %3064 = vmatpush1.bf16.msra.mxu0 %v4342_v57 }
 0x27f   :  { %3065 = vmatprep.subr.bf16.mxu0 %v4347_v58 }
 0x282   :  { %3066 = vmatpush1.bf16.msra.mxu0 %v4345_v59 }
 0x283   :  { %3067 = vmatprep.subr.bf16.mxu0 %v4350_v60 }
 0x286   :  { %3068 = vmatpush1.bf16.msra.mxu0 %v4348_v61 }
 0x287   :  { %3069 = vmatprep.subr.bf16.mxu0 %v4353_v62 }
 0x28a   :  { %3070 = vmatpush1.bf16.msra.mxu0 %v4351_v63 }
 0x28b   :  { %3071 = vmatprep.subr.bf16.mxu0 %v4356_v0 }
 0x28e   :  { %3072 = vmatpush1.bf16.msra.mxu0 %v4354_v1 }
 0x28f   :  { %3073 = vmatprep.subr.bf16.mxu0 %v4359_v2 }
 0x292   :  { %3074 = vmatpush1.bf16.msra.mxu0 %v4357_v3 }
 0x293   :  { %3075 = vmatprep.subr.bf16.mxu0 %v4362_v4 }
 0x296   :  { %3076 = vmatpush1.bf16.msra.mxu0 %v4360_v5 }
 0x297   :  { %3077 = vmatprep.subr.bf16.mxu0 %v4365_v6 }
 0x29a   :  { %3078 = vmatpush1.bf16.msra.mxu0 %v4363_v7 }
 0x29b   :  { %3079 = vmatprep.subr.bf16.mxu0 %v4368_v9 }
 0x29e   :  { %3080 = vmatpush1.bf16.msra.mxu0 %v4366_v10 }
 0x29f   :  { %3081 = vmatprep.subr.bf16.mxu0 %v4371_v12 }
 0x2a2   :  { %3082 = vmatpush1.bf16.msra.mxu0 %v4369_v13 }
 0x2a3   :  { %3083 = vmatprep.subr.bf16.mxu0 %v4374_v14 }
 0x2a6   :  { %3084 = vmatpush1.bf16.msra.mxu0 %v4372_v20 }
 0x2d3   :  { %v2560_v25 = vpop.f32.mrb[4].mxu1 }
 0x2d4   :  { %v3736_v27 = vadd.f32 %v2560_v25, %v474_v32  ;;  %v2562_v28 = vpop.f32.mrb[5].mxu1 }
 0x2d5   :  { %v3738_v29 = vadd.f32 %v2562_v28, %v478_v24  ;;  %v2564_v30 = vpop.f32.mrb[6].mxu1 }
 0x2d6   :  { %v3737_v31 = vadd.f32 %v3736_v27, %v4784_v42  ;;  %v2565_v33 = vpop.f32.mrb[7].mxu1 }
 0x2d7   :  { %v3739_v34 = vadd.f32 %v3738_v29, %v4786_v36 }
 0x2d8   :  { %v2610_v35 = vmax.f32 %v3737_v31, 0.0 }
 0x2d9   :  { %v2611_v52 = vmax.f32 %v3739_v34, 0.0 }
 0x2da   :  { %v2614_v37 = vpack.c.bf16 %v2610_v35, %v2610_v35 }
 0x2db   :  { %v2615_v11 = vpack.c.bf16 %v2611_v52, %v2611_v52 }
 0x2dd   :  { %3085 = vmatprep.mubr.bf16.mxu0 %v2615_v11 }
 0x2de   :  { %3086 = vmatmul.mubr.bf16.vlgmr.msra.gmra.mrb[8].mxu0 %v2614_v37 }
 0x3b1   :  { %v3087_v42 = vpop.f32.mrb[8].mxu0 }
 0x3b2   :  { %v3740_v36 = vadd.f32 %v3087_v42, %v2685_v41  ;;  %v3089_v16 = vpop.f32.mrb[9].mxu0 }
 0x3b3   :  { %v3741_v43 = vadd.f32 %v3089_v16, %v2689_v53  ;;  %v3091_v44 = vpop.f32.mrb[10].mxu0 }
 0x3b4   :  { %v3094_v45 = vmax.f32 %v3740_v36, 0.0  ;;  %v3092_v23 = vpop.f32.mrb[11].mxu0 }
 0x3b5   :  { %v3095_v26 = vmax.f32 %v3741_v43, 0.0 }
 0x3b6   :  { %v3096_v46 = vpack.c.bf16 %v3094_v45, %v3094_v45 }
 0x3b7   :  { %v3097_v8 = vpack.c.bf16 %v3095_v26, %v3095_v26 }
 0x3b9   :  { %3265 = vmatprep.mubr.bf16.mxu1 %v3097_v8 }
 0x3ba   :  { %3266 = vmatmul.mubr.bf16.vlgmr.msra.gmra.mrb[8].mxu1 %v3096_v46 }
 0x48d   :  { %v3726_v47 = vpop.f32.mrb[8].mxu1 }
 0x48e   :  { %v3727_v48 = vpop.f32.mrb[9].mxu1 }
 0x48f   :  { %v3728_v50 = vadd.f32 %v3727_v48, %v3726_v47  ;;  %v3729_v17 = vpop.f32.mrb[10].mxu1 }
 0x490   :  { %v3730_v54 = vpop.f32.mrb[11].mxu1 }
 0x491   :  { %v3268_v15 = vadd.f32 %v3728_v50, %v3693_v49 }
 0x493   :  { %3273 = vmax.xlane.f32.xlu0 %v3268_v15 }
 0x520   :  { %v3274_v19 = vpop.xlane.xlu0 %3273 }
 0x521   :  { %v3275_v55 = vsub.f32 %v3268_v15, %v3274_v19 }
 0x523   :  { %v3276_v56 = vmul.f32 1.442695, %v3275_v55 }
 0x525   :  { %4391 = vpow2.f32 %v3276_v56 }
 0x52f   :  { %v4392_v57 = vpop.eup %4391 }
 0x530   :  { %3278 = vadd.xlane.f32.xlu0 %v4392_v57 }
 0x5bd   :  { %v3279_v58 = vpop.xlane.xlu0 %3278 }
 0x5be   :  { %4393 = vrcp.f32 %v3279_v58 }
 0x5c8   :  { %v4394_v59 = vpop.eup %4393 }
 0x5c9   :  { %v3281_v60 = vmul.f32 %v4394_v59, %v4392_v57 }
 0x5cb   :  { %3282 = vst [vmem:[#allocation14] sm:$0xff] %v3281_v60 }
 0x5cc   :  { %4560 = shalt.err (!%p4557_p4)
}
 0x5cd   :  { %s4561_s15 = scalar_lea.hbm %s4817_s7, 128 }
 0x5ce   :  { %p4562_p5 = scmp.ne.s32.totalorder %s4817_s7, %s4561_s15  ;;  %p4565_p6 = scmp.lt.u32.totalorder %s4561_s15, %s4817_s7 }
 0x5d0   :  { %p4567_p7 = pnand %p4565_p6, %p4562_p5 }
 0x5d2   :  { %4570 = shalt.err (!%p4567_p7)
}
 0x5d3   :  { %3292 = dma.vmem_to_hbm [thread:$0]  %s3290_s13, 128, %s4817_s7, [#allocation4]  }
 0x5d4   :  { %4579 = dma.done.wait [#allocation4], 128  }
 0x5d5   :  { %4580 = vsyncadd [#allocation4], 4294967168 }
 0x5d6   :  { %3296 = vsyncpa [#allocation3], 1 }
 0x5d7   :  { %3297 = vsyncpa [#allocation6], 1 }
 0x5d8   :  { %3298 = vsyncpa [#allocation9], 1 }
 0x5d9   :  { %3299 = vsyncpa [#allocation12], 1 }
 0x5da   :  { %3300 = vsyncpa [#allocation4], 1 }

</bundles_post_ra>
